<compile_context>
chip_gen: v5e
topology: v5e:2x2
jax: 0.10.0
libtpu: 0.0.40
codegen_flags: <defaults>
</compile_context>

<pallas_src>
import functools

import jax
import jax.numpy as jnp
from jax import lax
from jax.experimental import pallas as pl
from jax.experimental.pallas import tpu as pltpu

MAX_FACTOR = 133.30156039087368
MIN_FACTOR = 384.14945126956343

C_OUT = 6
KSIZE = 3
STRIDE = 2
PAD = 1
NTAPS = KSIZE * KSIZE  # 9


def _round_up(x, m):
    return (x + m - 1) // m * m


def _conv_clamp_kernel(w_ref, b_ref, xd_ref, o_ref, *, nb, tr, ow, min_clamp, max_clamp):
    # w_ref : SMEM (54,) f32   -- conv weights, index c*9 + kh*3 + kw
    # b_ref : SMEM (6,)  f32   -- bias
    # xd_ref: VMEM (nb, 4, tr+1, owl) f32 -- deinterleaved planes [ee, eo, oe, oo] of this
    #                                        batch/row-group block (1 halo row at the bottom)
    # o_ref : VMEM (nb, 6, tr, ow) f32
    owl = xd_ref.shape[-1]
    lane_vregs = max(1, owl // 128)

    # Rows computed per inner iteration: bounds the live register set (one (nb, rc, ow)
    # accumulator + one tap view) independently of the (large) pipelined DMA block.
    rc = min(tr, 8)
    for cand in (64, 32, 16):
        if cand <= tr and nb * (cand // 8) * lane_vregs <= 8:
            rc = cand
            break
    while tr % rc != 0 and rc > 8:   # prefer an exact split (avoids recompute overlap)
        rc -= 8
    n_chunks = pl.cdiv(tr, rc)

    def compute_rows(r0):
        for c in range(C_OUT):
            # accumulator starts at the bias -> no separate bias pass
            acc = jnp.full((nb, rc, ow), b_ref[c], dtype=jnp.float32)
            for kh in range(KSIZE):
                dr = kh // 2                       # +1 sublane shift for kh == 2
                for kw in range(KSIZE):
                    dc = kw // 2                   # +1 lane shift for kw == 2
                    q = 2 * (kh & 1) + (kw & 1)    # which deinterleaved plane
                    tap = xd_ref[:, q, pl.ds(r0 + dr, rc), pl.ds(dc, ow)]
                    acc = acc + w_ref[c * NTAPS + kh * KSIZE + kw] * tap
            acc = jnp.maximum(acc, min_clamp)      # torch.clamp_min
            acc = jnp.minimum(acc, max_clamp)      # torch.clamp_max
            o_ref[:, c, pl.ds(r0, rc), :] = acc

    if n_chunks == 1:
        compute_rows(0)
    else:
        def body(i, carry):
            # clamp the last (possibly partial) chunk instead of going out of bounds
            compute_rows(jnp.minimum(i * rc, tr - rc))
            return carry
        lax.fori_loop(0, n_chunks, body, 0)


def _choose_partition(n, oh, ow, owl, row_groups):
    """Pick (batch block nb, row groups g, rows-per-group tr)."""
    budget = 10 << 20                 # per-step VMEM incl. double buffering; fits default
    lane_vregs = max(1, owl // 128)   # scoped VMEM on v5e (16M) / v6e (32M) / v7x (32M)

    def step_bytes(nb, tr):           # one pipelined grid step, (8,128)-padded, x2 buffers
        in_b = nb * 4 * _round_up(tr + 1, 8) * owl * 4
        out_b = nb * C_OUT * _round_up(tr, 8) * _round_up(ow, 128) * 4
        return 2 * (in_b + out_b)

    def tr_for(g):
        return oh if g <= 1 else _round_up(pl.cdiv(oh, g), 8)

    if row_groups is not None:
        g = max(1, int(row_groups))
    else:
        g = 1
        while step_bytes(1, tr_for(g)) > budget and tr_for(g) > 8:
            g += 1
    tr = tr_for(g)

    divs = [d for d in range(1, n + 1) if n % d == 0]
    fitting = [d for d in divs
               if step_bytes(d, tr) <= budget and d * lane_vregs <= 8] or [1]
    nb = max(fitting)

    # v7x megacore: prefer >= 2 grid steps along a parallel axis when there is enough work.
    total_bytes = 4 * n * (4 * (oh + g) * owl + C_OUT * oh * _round_up(ow, 128))
    if row_groups is None and (n // nb) * g < 2 and total_bytes > (2 << 20):
        if n >= 2:
            nb = max([d for d in fitting if d < n] or [1])
        elif oh > 8:
            g, tr = 2, tr_for(2)
    return nb, g, tr


@functools.partial(jax.jit, static_argnames=("min_clamp", "max_clamp", "row_groups"))
def conv_clamp(x, w, b, *, min_clamp=MIN_FACTOR, max_clamp=MAX_FACTOR, row_groups=None):
    """x: (N,1,H,W), w: (6,1,3,3) OIHW, b: (6,) -> (N,6,OH,OW) float32."""
    n, cin, h, wdt = x.shape
    assert cin == 1
    oh = (h + 2 * PAD - KSIZE) // STRIDE + 1
    ow = (wdt + 2 * PAD - KSIZE) // STRIDE + 1
    owl = _round_up(ow + 1, 128)      # lane-padded plane width (+1 column halo for kw == 2)

    nb, g, tr = _choose_partition(n, oh, ow, owl, row_groups)
    oh_pad = g * tr

    # --- deinterleave the (zero-padded) input into 4 planes: no size amplification ---
    # plane[q][i, j] = x_pad[2i + (q>>1), 2j + (q&1)]
    rp = 2 * oh_pad + 2
    cp = 2 * ow + 2
    xf = x[:, 0].astype(jnp.float32)
    xp = jnp.pad(xf, ((0, 0), (PAD, rp - h - PAD), (PAD, cp - wdt - PAD)))
    xe, xo = xp[:, 0::2, :], xp[:, 1::2, :]                     # even / odd input rows
    planes = [xe[:, :, 0::2], xe[:, :, 1::2],                   # ee, eo
              xo[:, :, 0::2], xo[:, :, 1::2]]                   # oe, oo
    planes = [jnp.pad(p, ((0, 0), (0, 0), (0, owl - p.shape[2]))) for p in planes]
    quads = jnp.stack(planes, axis=1)                           # (n, 4, oh_pad+1, owl)
    # row groups with a 1-row bottom halo, group-major along axis 1 -> (n, 4*g, tr+1, owl)
    xd = jnp.concatenate([quads[:, :, k * tr:k * tr + tr + 1, :] for k in range(g)], axis=1)

    w_flat = w.reshape(C_OUT * NTAPS).astype(jnp.float32)       # [c, kh, kw] order
    b_flat = b.reshape(C_OUT).astype(jnp.float32)

    kernel = functools.partial(
        _conv_clamp_kernel, nb=nb, tr=tr, ow=ow,
        min_clamp=float(min_clamp), max_clamp=float(max_clamp))

    out = pl.pallas_call(
        kernel,
        out_shape=jax.ShapeDtypeStruct((n, C_OUT, oh_pad, ow), jnp.float32),
        grid=(n // nb, g),
        in_specs=[
            pl.BlockSpec(memory_space=pltpu.MemorySpace.SMEM),          # weights (54,)
            pl.BlockSpec(memory_space=pltpu.MemorySpace.SMEM),          # bias (6,)
            pl.BlockSpec((nb, 4, tr + 1, owl), lambda i, k: (i, k, 0, 0)),
        ],
        out_specs=pl.BlockSpec((nb, C_OUT, tr, ow), lambda i, k: (i, 0, k, 0)),
        compiler_params=pltpu.CompilerParams(
            dimension_semantics=("parallel", "parallel")),
    )(w_flat, b_flat, xd)

    if oh_pad != oh:                  # only materializes a copy for odd row counts
        out = out[:, :, :oh, :]
    return out


def _reference(x, w, b, min_c, max_c):
    conv = lax.conv_general_dilated(
        x.astype(jnp.float32), w.astype(jnp.float32),
        window_strides=(STRIDE, STRIDE),
        padding=((PAD, PAD), (PAD, PAD)),
        dimension_numbers=("NCHW", "OIHW", "NCHW"))
    conv = conv + b[None, :, None, None]
    return jnp.minimum(jnp.maximum(conv, min_c), max_c)


if __name__ == "__main__":
    key = jax.random.PRNGKey(0)
    kx, kw_, kb_, k2, k3 = jax.random.split(key, 5)

    # PyTorch-style uniform(-1/sqrt(fan_in), 1/sqrt(fan_in)) init for Conv2d(1, 6, 3)
    fan_in = 1 * KSIZE * KSIZE
    bound = 1.0 / (fan_in ** 0.5)
    w = jax.random.uniform(kw_, (C_OUT, 1, KSIZE, KSIZE),
                           minval=-bound, maxval=bound, dtype=jnp.float32)
    b = jax.random.uniform(kb_, (C_OUT,), minval=-bound, maxval=bound, dtype=jnp.float32)

    # --- primary test: small shapes consistent with the module ---
    N, H, W = 2, 16, 16
    x = jax.random.normal(kx, (N, 1, H, W), dtype=jnp.float32)

    out = jax.block_until_ready(conv_clamp(x, w, b))
    ref = _reference(x, w, b, MIN_FACTOR, MAX_FACTOR)
    assert out.shape == (N, C_OUT, H // 2, W // 2), out.shape
    assert jnp.allclose(out, ref, atol=1e-5, rtol=1e-5), "mismatch vs reference (module constants)"

    # non-saturating bounds so the conv math is actually observable (module constants saturate)
    out_open = jax.block_until_ready(conv_clamp(x, w, b, min_clamp=-1e30, max_clamp=1e30))
    ref_open = _reference(x, w, b, -1e30, 1e30)
    assert jnp.allclose(out_open, ref_open, atol=1e-4, rtol=1e-4), "conv mismatch"

    # --- odd spatial sizes: exercises the multi-chunk fori_loop + clamped last chunk ---
    x2 = jax.random.normal(k2, (1, 1, 33, 35), dtype=jnp.float32)
    out2 = jax.block_until_ready(conv_clamp(x2, w, b, min_clamp=-1e30, max_clamp=1e30))
    ref2 = _reference(x2, w, b, -1e30, 1e30)
    assert out2.shape == ref2.shape, (out2.shape, ref2.shape)
    assert jnp.allclose(out2, ref2, atol=1e-4, rtol=1e-4), "conv mismatch (odd sizes)"

    # --- forced row-group split: exercises the halo blocks and a 2-step parallel grid ---
    x3 = jax.random.normal(k3, (1, 1, 32, 32), dtype=jnp.float32)
    out3 = jax.block_until_ready(
        conv_clamp(x3, w, b, min_clamp=-1e30, max_clamp=1e30, row_groups=2))
    ref3 = _reference(x3, w, b, -1e30, 1e30)
    assert jnp.allclose(out3, ref3, atol=1e-4, rtol=1e-4), "conv mismatch (row groups)"

    print("KERNEL_OK")
</pallas_src>

<mosaic_0001>
module attributes {stable_mosaic.version = 11 : i64} {
  func.func @_conv_clamp_kernel(%arg0: i32, %arg1: i32, %arg2: memref<54xf32, #tpu.memory_space<smem>>, %arg3: memref<6xf32, #tpu.memory_space<smem>>, %arg4: memref<2x4x9x128xf32, #tpu.memory_space<vmem>>, %arg5: memref<2x6x8x8xf32, #tpu.memory_space<vmem>>) attributes {dimension_semantics = [#tpu.dimension_semantics<parallel>, #tpu.dimension_semantics<parallel>], iteration_bounds = array<i64: 1, 1>, scalar_prefetch = 0 : i64, scratch_operands = 0 : i64, tpu.core_type = #tpu.core_type<tc>, window_params = [{transform_indices = @transform_0, window_bounds = array<i64: 54>}, {transform_indices = @transform_1, window_bounds = array<i64: 6>}, {transform_indices = @transform_2, window_bounds = array<i64: 2, 4, 9, 128>}, {transform_indices = @transform_3, window_bounds = array<i64: 2, 6, 8, 8>}]} {
    %c0 = arith.constant 0 : index
    %0 = memref.load %arg3[%c0] : memref<6xf32, #tpu.memory_space<smem>>
    %1 = vector.broadcast %0 : f32 to vector<2x8x8xf32>
    %c0_0 = arith.constant 0 : index
    %c0_1 = arith.constant 0 : index
    %c0_2 = arith.constant 0 : index
    %c0_3 = arith.constant 0 : index
    %2 = vector.load %arg4[%c0_0, %c0_1, %c0_2, %c0_3] : memref<2x4x9x128xf32, #tpu.memory_space<vmem>>, vector<2x1x8x8xf32>
    %3 = vector.shape_cast %2 : vector<2x1x8x8xf32> to vector<2x8x8xf32>
    %c0_4 = arith.constant 0 : index
    %4 = memref.load %arg2[%c0_4] : memref<54xf32, #tpu.memory_space<smem>>
    %5 = vector.broadcast %4 : f32 to vector<2x8x8xf32>
    %6 = arith.mulf %5, %3 : vector<2x8x8xf32>
    %7 = arith.addf %1, %6 : vector<2x8x8xf32>
    %c0_5 = arith.constant 0 : index
    %c1 = arith.constant 1 : index
    %c0_6 = arith.constant 0 : index
    %c0_7 = arith.constant 0 : index
    %8 = vector.load %arg4[%c0_5, %c1, %c0_6, %c0_7] : memref<2x4x9x128xf32, #tpu.memory_space<vmem>>, vector<2x1x8x8xf32>
    %9 = vector.shape_cast %8 : vector<2x1x8x8xf32> to vector<2x8x8xf32>
    %c1_8 = arith.constant 1 : index
    %10 = memref.load %arg2[%c1_8] : memref<54xf32, #tpu.memory_space<smem>>
    %11 = vector.broadcast %10 : f32 to vector<2x8x8xf32>
    %12 = arith.mulf %11, %9 : vector<2x8x8xf32>
    %13 = arith.addf %7, %12 : vector<2x8x8xf32>
    %c0_9 = arith.constant 0 : index
    %c0_10 = arith.constant 0 : index
    %c0_11 = arith.constant 0 : index
    %c1_12 = arith.constant 1 : index
    %14 = vector.load %arg4[%c0_9, %c0_10, %c0_11, %c1_12] : memref<2x4x9x128xf32, #tpu.memory_space<vmem>>, vector<2x1x8x8xf32>
    %15 = vector.shape_cast %14 : vector<2x1x8x8xf32> to vector<2x8x8xf32>
    %c2 = arith.constant 2 : index
    %16 = memref.load %arg2[%c2] : memref<54xf32, #tpu.memory_space<smem>>
    %17 = vector.broadcast %16 : f32 to vector<2x8x8xf32>
    %18 = arith.mulf %17, %15 : vector<2x8x8xf32>
    %19 = arith.addf %13, %18 : vector<2x8x8xf32>
    %c0_13 = arith.constant 0 : index
    %c2_14 = arith.constant 2 : index
    %c0_15 = arith.constant 0 : index
    %c0_16 = arith.constant 0 : index
    %20 = vector.load %arg4[%c0_13, %c2_14, %c0_15, %c0_16] : memref<2x4x9x128xf32, #tpu.memory_space<vmem>>, vector<2x1x8x8xf32>
    %21 = vector.shape_cast %20 : vector<2x1x8x8xf32> to vector<2x8x8xf32>
    %c3 = arith.constant 3 : index
    %22 = memref.load %arg2[%c3] : memref<54xf32, #tpu.memory_space<smem>>
    %23 = vector.broadcast %22 : f32 to vector<2x8x8xf32>
    %24 = arith.mulf %23, %21 : vector<2x8x8xf32>
    %25 = arith.addf %19, %24 : vector<2x8x8xf32>
    %c0_17 = arith.constant 0 : index
    %c3_18 = arith.constant 3 : index
    %c0_19 = arith.constant 0 : index
    %c0_20 = arith.constant 0 : index
    %26 = vector.load %arg4[%c0_17, %c3_18, %c0_19, %c0_20] : memref<2x4x9x128xf32, #tpu.memory_space<vmem>>, vector<2x1x8x8xf32>
    %27 = vector.shape_cast %26 : vector<2x1x8x8xf32> to vector<2x8x8xf32>
    %c4 = arith.constant 4 : index
    %28 = memref.load %arg2[%c4] : memref<54xf32, #tpu.memory_space<smem>>
    %29 = vector.broadcast %28 : f32 to vector<2x8x8xf32>
    %30 = arith.mulf %29, %27 : vector<2x8x8xf32>
    %31 = arith.addf %25, %30 : vector<2x8x8xf32>
    %c0_21 = arith.constant 0 : index
    %c2_22 = arith.constant 2 : index
    %c0_23 = arith.constant 0 : index
    %c1_24 = arith.constant 1 : index
    %32 = vector.load %arg4[%c0_21, %c2_22, %c0_23, %c1_24] : memref<2x4x9x128xf32, #tpu.memory_space<vmem>>, vector<2x1x8x8xf32>
    %33 = vector.shape_cast %32 : vector<2x1x8x8xf32> to vector<2x8x8xf32>
    %c5 = arith.constant 5 : index
    %34 = memref.load %arg2[%c5] : memref<54xf32, #tpu.memory_space<smem>>
    %35 = vector.broadcast %34 : f32 to vector<2x8x8xf32>
    %36 = arith.mulf %35, %33 : vector<2x8x8xf32>
    %37 = arith.addf %31, %36 : vector<2x8x8xf32>
    %c0_25 = arith.constant 0 : index
    %c0_26 = arith.constant 0 : index
    %c1_27 = arith.constant 1 : index
    %c0_28 = arith.constant 0 : index
    %38 = vector.load %arg4[%c0_25, %c0_26, %c1_27, %c0_28] : memref<2x4x9x128xf32, #tpu.memory_space<vmem>>, vector<2x1x8x8xf32>
    %39 = vector.shape_cast %38 : vector<2x1x8x8xf32> to vector<2x8x8xf32>
    %c6 = arith.constant 6 : index
    %40 = memref.load %arg2[%c6] : memref<54xf32, #tpu.memory_space<smem>>
    %41 = vector.broadcast %40 : f32 to vector<2x8x8xf32>
    %42 = arith.mulf %41, %39 : vector<2x8x8xf32>
    %43 = arith.addf %37, %42 : vector<2x8x8xf32>
    %c0_29 = arith.constant 0 : index
    %c1_30 = arith.constant 1 : index
    %c1_31 = arith.constant 1 : index
    %c0_32 = arith.constant 0 : index
    %44 = vector.load %arg4[%c0_29, %c1_30, %c1_31, %c0_32] : memref<2x4x9x128xf32, #tpu.memory_space<vmem>>, vector<2x1x8x8xf32>
    %45 = vector.shape_cast %44 : vector<2x1x8x8xf32> to vector<2x8x8xf32>
    %c7 = arith.constant 7 : index
    %46 = memref.load %arg2[%c7] : memref<54xf32, #tpu.memory_space<smem>>
    %47 = vector.broadcast %46 : f32 to vector<2x8x8xf32>
    %48 = arith.mulf %47, %45 : vector<2x8x8xf32>
    %49 = arith.addf %43, %48 : vector<2x8x8xf32>
    %c0_33 = arith.constant 0 : index
    %c0_34 = arith.constant 0 : index
    %c1_35 = arith.constant 1 : index
    %c1_36 = arith.constant 1 : index
    %50 = vector.load %arg4[%c0_33, %c0_34, %c1_35, %c1_36] : memref<2x4x9x128xf32, #tpu.memory_space<vmem>>, vector<2x1x8x8xf32>
    %51 = vector.shape_cast %50 : vector<2x1x8x8xf32> to vector<2x8x8xf32>
    %c8 = arith.constant 8 : index
    %52 = memref.load %arg2[%c8] : memref<54xf32, #tpu.memory_space<smem>>
    %53 = vector.broadcast %52 : f32 to vector<2x8x8xf32>
    %54 = arith.mulf %53, %51 : vector<2x8x8xf32>
    %55 = arith.addf %49, %54 : vector<2x8x8xf32>
    %cst = arith.constant 384.149445 : f32
    %56 = vector.broadcast %cst : f32 to vector<2x8x8xf32>
    %57 = arith.maximumf %55, %56 : vector<2x8x8xf32>
    %cst_37 = arith.constant 133.301559 : f32
    %58 = vector.broadcast %cst_37 : f32 to vector<2x8x8xf32>
    %59 = arith.minimumf %57, %58 : vector<2x8x8xf32>
    %c0_38 = arith.constant 0 : index
    %c0_39 = arith.constant 0 : index
    %c0_40 = arith.constant 0 : index
    %c0_41 = arith.constant 0 : index
    %60 = vector.load %arg5[%c0_38, %c0_39, %c0_40, %c0_41] : memref<2x6x8x8xf32, #tpu.memory_space<vmem>>, vector<2x1x8x8xf32>
    %61 = vector.shape_cast %60 : vector<2x1x8x8xf32> to vector<2x8x8xf32>
    %62 = vector.shape_cast %59 : vector<2x8x8xf32> to vector<2x1x8x8xf32>
    tpu.vector_store %arg5[%c0_38, %c0_39, %c0_40, %c0_41], %62 {strides = array<i32>} : memref<2x6x8x8xf32, #tpu.memory_space<vmem>>, vector<2x1x8x8xf32>,
    %c1_42 = arith.constant 1 : index
    %63 = memref.load %arg3[%c1_42] : memref<6xf32, #tpu.memory_space<smem>>
    %64 = vector.broadcast %63 : f32 to vector<2x8x8xf32>
    %c0_43 = arith.constant 0 : index
    %c0_44 = arith.constant 0 : index
    %c0_45 = arith.constant 0 : index
    %c0_46 = arith.constant 0 : index
    %65 = vector.load %arg4[%c0_43, %c0_44, %c0_45, %c0_46] : memref<2x4x9x128xf32, #tpu.memory_space<vmem>>, vector<2x1x8x8xf32>
    %66 = vector.shape_cast %65 : vector<2x1x8x8xf32> to vector<2x8x8xf32>
    %c9 = arith.constant 9 : index
    %67 = memref.load %arg2[%c9] : memref<54xf32, #tpu.memory_space<smem>>
    %68 = vector.broadcast %67 : f32 to vector<2x8x8xf32>
    %69 = arith.mulf %68, %66 : vector<2x8x8xf32>
    %70 = arith.addf %64, %69 : vector<2x8x8xf32>
    %c0_47 = arith.constant 0 : index
    %c1_48 = arith.constant 1 : index
    %c0_49 = arith.constant 0 : index
    %c0_50 = arith.constant 0 : index
    %71 = vector.load %arg4[%c0_47, %c1_48, %c0_49, %c0_50] : memref<2x4x9x128xf32, #tpu.memory_space<vmem>>, vector<2x1x8x8xf32>
    %72 = vector.shape_cast %71 : vector<2x1x8x8xf32> to vector<2x8x8xf32>
    %c10 = arith.constant 10 : index
    %73 = memref.load %arg2[%c10] : memref<54xf32, #tpu.memory_space<smem>>
    %74 = vector.broadcast %73 : f32 to vector<2x8x8xf32>
    %75 = arith.mulf %74, %72 : vector<2x8x8xf32>
    %76 = arith.addf %70, %75 : vector<2x8x8xf32>
    %c0_51 = arith.constant 0 : index
    %c0_52 = arith.constant 0 : index
    %c0_53 = arith.constant 0 : index
    %c1_54 = arith.constant 1 : index
    %77 = vector.load %arg4[%c0_51, %c0_52, %c0_53, %c1_54] : memref<2x4x9x128xf32, #tpu.memory_space<vmem>>, vector<2x1x8x8xf32>
    %78 = vector.shape_cast %77 : vector<2x1x8x8xf32> to vector<2x8x8xf32>
    %c11 = arith.constant 11 : index
    %79 = memref.load %arg2[%c11] : memref<54xf32, #tpu.memory_space<smem>>
    %80 = vector.broadcast %79 : f32 to vector<2x8x8xf32>
    %81 = arith.mulf %80, %78 : vector<2x8x8xf32>
    %82 = arith.addf %76, %81 : vector<2x8x8xf32>
    %c0_55 = arith.constant 0 : index
    %c2_56 = arith.constant 2 : index
    %c0_57 = arith.constant 0 : index
    %c0_58 = arith.constant 0 : index
    %83 = vector.load %arg4[%c0_55, %c2_56, %c0_57, %c0_58] : memref<2x4x9x128xf32, #tpu.memory_space<vmem>>, vector<2x1x8x8xf32>
    %84 = vector.shape_cast %83 : vector<2x1x8x8xf32> to vector<2x8x8xf32>
    %c12 = arith.constant 12 : index
    %85 = memref.load %arg2[%c12] : memref<54xf32, #tpu.memory_space<smem>>
    %86 = vector.broadcast %85 : f32 to vector<2x8x8xf32>
    %87 = arith.mulf %86, %84 : vector<2x8x8xf32>
    %88 = arith.addf %82, %87 : vector<2x8x8xf32>
    %c0_59 = arith.constant 0 : index
    %c3_60 = arith.constant 3 : index
    %c0_61 = arith.constant 0 : index
    %c0_62 = arith.constant 0 : index
    %89 = vector.load %arg4[%c0_59, %c3_60, %c0_61, %c0_62] : memref<2x4x9x128xf32, #tpu.memory_space<vmem>>, vector<2x1x8x8xf32>
    %90 = vector.shape_cast %89 : vector<2x1x8x8xf32> to vector<2x8x8xf32>
    %c13 = arith.constant 13 : index
    %91 = memref.load %arg2[%c13] : memref<54xf32, #tpu.memory_space<smem>>
    %92 = vector.broadcast %91 : f32 to vector<2x8x8xf32>
    %93 = arith.mulf %92, %90 : vector<2x8x8xf32>
    %94 = arith.addf %88, %93 : vector<2x8x8xf32>
    %c0_63 = arith.constant 0 : index
    %c2_64 = arith.constant 2 : index
    %c0_65 = arith.constant 0 : index
    %c1_66 = arith.constant 1 : index
    %95 = vector.load %arg4[%c0_63, %c2_64, %c0_65, %c1_66] : memref<2x4x9x128xf32, #tpu.memory_space<vmem>>, vector<2x1x8x8xf32>
    %96 = vector.shape_cast %95 : vector<2x1x8x8xf32> to vector<2x8x8xf32>
    %c14 = arith.constant 14 : index
    %97 = memref.load %arg2[%c14] : memref<54xf32, #tpu.memory_space<smem>>
    %98 = vector.broadcast %97 : f32 to vector<2x8x8xf32>
    %99 = arith.mulf %98, %96 : vector<2x8x8xf32>
    %100 = arith.addf %94, %99 : vector<2x8x8xf32>
    %c0_67 = arith.constant 0 : index
    %c0_68 = arith.constant 0 : index
    %c1_69 = arith.constant 1 : index
    %c0_70 = arith.constant 0 : index
    %101 = vector.load %arg4[%c0_67, %c0_68, %c1_69, %c0_70] : memref<2x4x9x128xf32, #tpu.memory_space<vmem>>, vector<2x1x8x8xf32>
    %102 = vector.shape_cast %101 : vector<2x1x8x8xf32> to vector<2x8x8xf32>
    %c15 = arith.constant 15 : index
    %103 = memref.load %arg2[%c15] : memref<54xf32, #tpu.memory_space<smem>>
    %104 = vector.broadcast %103 : f32 to vector<2x8x8xf32>
    %105 = arith.mulf %104, %102 : vector<2x8x8xf32>
    %106 = arith.addf %100, %105 : vector<2x8x8xf32>
    %c0_71 = arith.constant 0 : index
    %c1_72 = arith.constant 1 : index
    %c1_73 = arith.constant 1 : index
    %c0_74 = arith.constant 0 : index
    %107 = vector.load %arg4[%c0_71, %c1_72, %c1_73, %c0_74] : memref<2x4x9x128xf32, #tpu.memory_space<vmem>>, vector<2x1x8x8xf32>
    %108 = vector.shape_cast %107 : vector<2x1x8x8xf32> to vector<2x8x8xf32>
    %c16 = arith.constant 16 : index
    %109 = memref.load %arg2[%c16] : memref<54xf32, #tpu.memory_space<smem>>
    %110 = vector.broadcast %109 : f32 to vector<2x8x8xf32>
    %111 = arith.mulf %110, %108 : vector<2x8x8xf32>
    %112 = arith.addf %106, %111 : vector<2x8x8xf32>
    %c0_75 = arith.constant 0 : index
    %c0_76 = arith.constant 0 : index
    %c1_77 = arith.constant 1 : index
    %c1_78 = arith.constant 1 : index
    %113 = vector.load %arg4[%c0_75, %c0_76, %c1_77, %c1_78] : memref<2x4x9x128xf32, #tpu.memory_space<vmem>>, vector<2x1x8x8xf32>
    %114 = vector.shape_cast %113 : vector<2x1x8x8xf32> to vector<2x8x8xf32>
    %c17 = arith.constant 17 : index
    %115 = memref.load %arg2[%c17] : memref<54xf32, #tpu.memory_space<smem>>
    %116 = vector.broadcast %115 : f32 to vector<2x8x8xf32>
    %117 = arith.mulf %116, %114 : vector<2x8x8xf32>
    %118 = arith.addf %112, %117 : vector<2x8x8xf32>
    %cst_79 = arith.constant 384.149445 : f32
    %119 = vector.broadcast %cst_79 : f32 to vector<2x8x8xf32>
    %120 = arith.maximumf %118, %119 : vector<2x8x8xf32>
    %cst_80 = arith.constant 133.301559 : f32
    %121 = vector.broadcast %cst_80 : f32 to vector<2x8x8xf32>
    %122 = arith.minimumf %120, %121 : vector<2x8x8xf32>
    %c0_81 = arith.constant 0 : index
    %c1_82 = arith.constant 1 : index
    %c0_83 = arith.constant 0 : index
    %c0_84 = arith.constant 0 : index
    %123 = vector.load %arg5[%c0_81, %c1_82, %c0_83, %c0_84] : memref<2x6x8x8xf32, #tpu.memory_space<vmem>>, vector<2x1x8x8xf32>
    %124 = vector.shape_cast %123 : vector<2x1x8x8xf32> to vector<2x8x8xf32>
    %125 = vector.shape_cast %122 : vector<2x8x8xf32> to vector<2x1x8x8xf32>
    tpu.vector_store %arg5[%c0_81, %c1_82, %c0_83, %c0_84], %125 {strides = array<i32>} : memref<2x6x8x8xf32, #tpu.memory_space<vmem>>, vector<2x1x8x8xf32>,
    %c2_85 = arith.constant 2 : index
    %126 = memref.load %arg3[%c2_85] : memref<6xf32, #tpu.memory_space<smem>>
    %127 = vector.broadcast %126 : f32 to vector<2x8x8xf32>
    %c0_86 = arith.constant 0 : index
    %c0_87 = arith.constant 0 : index
    %c0_88 = arith.constant 0 : index
    %c0_89 = arith.constant 0 : index
    %128 = vector.load %arg4[%c0_86, %c0_87, %c0_88, %c0_89] : memref<2x4x9x128xf32, #tpu.memory_space<vmem>>, vector<2x1x8x8xf32>
    %129 = vector.shape_cast %128 : vector<2x1x8x8xf32> to vector<2x8x8xf32>
    %c18 = arith.constant 18 : index
    %130 = memref.load %arg2[%c18] : memref<54xf32, #tpu.memory_space<smem>>
    %131 = vector.broadcast %130 : f32 to vector<2x8x8xf32>
    %132 = arith.mulf %131, %129 : vector<2x8x8xf32>
    %133 = arith.addf %127, %132 : vector<2x8x8xf32>
    %c0_90 = arith.constant 0 : index
    %c1_91 = arith.constant 1 : index
    %c0_92 = arith.constant 0 : index
    %c0_93 = arith.constant 0 : index
    %134 = vector.load %arg4[%c0_90, %c1_91, %c0_92, %c0_93] : memref<2x4x9x128xf32, #tpu.memory_space<vmem>>, vector<2x1x8x8xf32>
    %135 = vector.shape_cast %134 : vector<2x1x8x8xf32> to vector<2x8x8xf32>
    %c19 = arith.constant 19 : index
    %136 = memref.load %arg2[%c19] : memref<54xf32, #tpu.memory_space<smem>>
    %137 = vector.broadcast %136 : f32 to vector<2x8x8xf32>
    %138 = arith.mulf %137, %135 : vector<2x8x8xf32>
    %139 = arith.addf %133, %138 : vector<2x8x8xf32>
    %c0_94 = arith.constant 0 : index
    %c0_95 = arith.constant 0 : index
    %c0_96 = arith.constant 0 : index
    %c1_97 = arith.constant 1 : index
    %140 = vector.load %arg4[%c0_94, %c0_95, %c0_96, %c1_97] : memref<2x4x9x128xf32, #tpu.memory_space<vmem>>, vector<2x1x8x8xf32>
    %141 = vector.shape_cast %140 : vector<2x1x8x8xf32> to vector<2x8x8xf32>
    %c20 = arith.constant 20 : index
    %142 = memref.load %arg2[%c20] : memref<54xf32, #tpu.memory_space<smem>>
    %143 = vector.broadcast %142 : f32 to vector<2x8x8xf32>
    %144 = arith.mulf %143, %141 : vector<2x8x8xf32>
    %145 = arith.addf %139, %144 : vector<2x8x8xf32>
    %c0_98 = arith.constant 0 : index
    %c2_99 = arith.constant 2 : index
    %c0_100 = arith.constant 0 : index
    %c0_101 = arith.constant 0 : index
    %146 = vector.load %arg4[%c0_98, %c2_99, %c0_100, %c0_101] : memref<2x4x9x128xf32, #tpu.memory_space<vmem>>, vector<2x1x8x8xf32>
    %147 = vector.shape_cast %146 : vector<2x1x8x8xf32> to vector<2x8x8xf32>
    %c21 = arith.constant 21 : index
    %148 = memref.load %arg2[%c21] : memref<54xf32, #tpu.memory_space<smem>>
    %149 = vector.broadcast %148 : f32 to vector<2x8x8xf32>
    %150 = arith.mulf %149, %147 : vector<2x8x8xf32>
    %151 = arith.addf %145, %150 : vector<2x8x8xf32>
    %c0_102 = arith.constant 0 : index
    %c3_103 = arith.constant 3 : index
    %c0_104 = arith.constant 0 : index
    %c0_105 = arith.constant 0 : index
    %152 = vector.load %arg4[%c0_102, %c3_103, %c0_104, %c0_105] : memref<2x4x9x128xf32, #tpu.memory_space<vmem>>, vector<2x1x8x8xf32>
    %153 = vector.shape_cast %152 : vector<2x1x8x8xf32> to vector<2x8x8xf32>
    %c22 = arith.constant 22 : index
    %154 = memref.load %arg2[%c22] : memref<54xf32, #tpu.memory_space<smem>>
    %155 = vector.broadcast %154 : f32 to vector<2x8x8xf32>
    %156 = arith.mulf %155, %153 : vector<2x8x8xf32>
    %157 = arith.addf %151, %156 : vector<2x8x8xf32>
    %c0_106 = arith.constant 0 : index
    %c2_107 = arith.constant 2 : index
    %c0_108 = arith.constant 0 : index
    %c1_109 = arith.constant 1 : index
    %158 = vector.load %arg4[%c0_106, %c2_107, %c0_108, %c1_109] : memref<2x4x9x128xf32, #tpu.memory_space<vmem>>, vector<2x1x8x8xf32>
    %159 = vector.shape_cast %158 : vector<2x1x8x8xf32> to vector<2x8x8xf32>
    %c23 = arith.constant 23 : index
    %160 = memref.load %arg2[%c23] : memref<54xf32, #tpu.memory_space<smem>>
    %161 = vector.broadcast %160 : f32 to vector<2x8x8xf32>
    %162 = arith.mulf %161, %159 : vector<2x8x8xf32>
    %163 = arith.addf %157, %162 : vector<2x8x8xf32>
    %c0_110 = arith.constant 0 : index
    %c0_111 = arith.constant 0 : index
    %c1_112 = arith.constant 1 : index
    %c0_113 = arith.constant 0 : index
    %164 = vector.load %arg4[%c0_110, %c0_111, %c1_112, %c0_113] : memref<2x4x9x128xf32, #tpu.memory_space<vmem>>, vector<2x1x8x8xf32>
    %165 = vector.shape_cast %164 : vector<2x1x8x8xf32> to vector<2x8x8xf32>
    %c24 = arith.constant 24 : index
    %166 = memref.load %arg2[%c24] : memref<54xf32, #tpu.memory_space<smem>>
    %167 = vector.broadcast %166 : f32 to vector<2x8x8xf32>
    %168 = arith.mulf %167, %165 : vector<2x8x8xf32>
    %169 = arith.addf %163, %168 : vector<2x8x8xf32>
    %c0_114 = arith.constant 0 : index
    %c1_115 = arith.constant 1 : index
    %c1_116 = arith.constant 1 : index
    %c0_117 = arith.constant 0 : index
    %170 = vector.load %arg4[%c0_114, %c1_115, %c1_116, %c0_117] : memref<2x4x9x128xf32, #tpu.memory_space<vmem>>, vector<2x1x8x8xf32>
    %171 = vector.shape_cast %170 : vector<2x1x8x8xf32> to vector<2x8x8xf32>
    %c25 = arith.constant 25 : index
    %172 = memref.load %arg2[%c25] : memref<54xf32, #tpu.memory_space<smem>>
    %173 = vector.broadcast %172 : f32 to vector<2x8x8xf32>
    %174 = arith.mulf %173, %171 : vector<2x8x8xf32>
    %175 = arith.addf %169, %174 : vector<2x8x8xf32>
    %c0_118 = arith.constant 0 : index
    %c0_119 = arith.constant 0 : index
    %c1_120 = arith.constant 1 : index
    %c1_121 = arith.constant 1 : index
    %176 = vector.load %arg4[%c0_118, %c0_119, %c1_120, %c1_121] : memref<2x4x9x128xf32, #tpu.memory_space<vmem>>, vector<2x1x8x8xf32>
    %177 = vector.shape_cast %176 : vector<2x1x8x8xf32> to vector<2x8x8xf32>
    %c26 = arith.constant 26 : index
    %178 = memref.load %arg2[%c26] : memref<54xf32, #tpu.memory_space<smem>>
    %179 = vector.broadcast %178 : f32 to vector<2x8x8xf32>
    %180 = arith.mulf %179, %177 : vector<2x8x8xf32>
    %181 = arith.addf %175, %180 : vector<2x8x8xf32>
    %cst_122 = arith.constant 384.149445 : f32
    %182 = vector.broadcast %cst_122 : f32 to vector<2x8x8xf32>
    %183 = arith.maximumf %181, %182 : vector<2x8x8xf32>
    %cst_123 = arith.constant 133.301559 : f32
    %184 = vector.broadcast %cst_123 : f32 to vector<2x8x8xf32>
    %185 = arith.minimumf %183, %184 : vector<2x8x8xf32>
    %c0_124 = arith.constant 0 : index
    %c2_125 = arith.constant 2 : index
    %c0_126 = arith.constant 0 : index
    %c0_127 = arith.constant 0 : index
    %186 = vector.load %arg5[%c0_124, %c2_125, %c0_126, %c0_127] : memref<2x6x8x8xf32, #tpu.memory_space<vmem>>, vector<2x1x8x8xf32>
    %187 = vector.shape_cast %186 : vector<2x1x8x8xf32> to vector<2x8x8xf32>
    %188 = vector.shape_cast %185 : vector<2x8x8xf32> to vector<2x1x8x8xf32>
    tpu.vector_store %arg5[%c0_124, %c2_125, %c0_126, %c0_127], %188 {strides = array<i32>} : memref<2x6x8x8xf32, #tpu.memory_space<vmem>>, vector<2x1x8x8xf32>,
    %c3_128 = arith.constant 3 : index
    %189 = memref.load %arg3[%c3_128] : memref<6xf32, #tpu.memory_space<smem>>
    %190 = vector.broadcast %189 : f32 to vector<2x8x8xf32>
    %c0_129 = arith.constant 0 : index
    %c0_130 = arith.constant 0 : index
    %c0_131 = arith.constant 0 : index
    %c0_132 = arith.constant 0 : index
    %191 = vector.load %arg4[%c0_129, %c0_130, %c0_131, %c0_132] : memref<2x4x9x128xf32, #tpu.memory_space<vmem>>, vector<2x1x8x8xf32>
    %192 = vector.shape_cast %191 : vector<2x1x8x8xf32> to vector<2x8x8xf32>
    %c27 = arith.constant 27 : index
    %193 = memref.load %arg2[%c27] : memref<54xf32, #tpu.memory_space<smem>>
    %194 = vector.broadcast %193 : f32 to vector<2x8x8xf32>
    %195 = arith.mulf %194, %192 : vector<2x8x8xf32>
    %196 = arith.addf %190, %195 : vector<2x8x8xf32>
    %c0_133 = arith.constant 0 : index
    %c1_134 = arith.constant 1 : index
    %c0_135 = arith.constant 0 : index
    %c0_136 = arith.constant 0 : index
    %197 = vector.load %arg4[%c0_133, %c1_134, %c0_135, %c0_136] : memref<2x4x9x128xf32, #tpu.memory_space<vmem>>, vector<2x1x8x8xf32>
    %198 = vector.shape_cast %197 : vector<2x1x8x8xf32> to vector<2x8x8xf32>
    %c28 = arith.constant 28 : index
    %199 = memref.load %arg2[%c28] : memref<54xf32, #tpu.memory_space<smem>>
    %200 = vector.broadcast %199 : f32 to vector<2x8x8xf32>
    %201 = arith.mulf %200, %198 : vector<2x8x8xf32>
    %202 = arith.addf %196, %201 : vector<2x8x8xf32>
    %c0_137 = arith.constant 0 : index
    %c0_138 = arith.constant 0 : index
    %c0_139 = arith.constant 0 : index
    %c1_140 = arith.constant 1 : index
    %203 = vector.load %arg4[%c0_137, %c0_138, %c0_139, %c1_140] : memref<2x4x9x128xf32, #tpu.memory_space<vmem>>, vector<2x1x8x8xf32>
    %204 = vector.shape_cast %203 : vector<2x1x8x8xf32> to vector<2x8x8xf32>
    %c29 = arith.constant 29 : index
    %205 = memref.load %arg2[%c29] : memref<54xf32, #tpu.memory_space<smem>>
    %206 = vector.broadcast %205 : f32 to vector<2x8x8xf32>
    %207 = arith.mulf %206, %204 : vector<2x8x8xf32>
    %208 = arith.addf %202, %207 : vector<2x8x8xf32>
    %c0_141 = arith.constant 0 : index
    %c2_142 = arith.constant 2 : index
    %c0_143 = arith.constant 0 : index
    %c0_144 = arith.constant 0 : index
    %209 = vector.load %arg4[%c0_141, %c2_142, %c0_143, %c0_144] : memref<2x4x9x128xf32, #tpu.memory_space<vmem>>, vector<2x1x8x8xf32>
    %210 = vector.shape_cast %209 : vector<2x1x8x8xf32> to vector<2x8x8xf32>
    %c30 = arith.constant 30 : index
    %211 = memref.load %arg2[%c30] : memref<54xf32, #tpu.memory_space<smem>>
    %212 = vector.broadcast %211 : f32 to vector<2x8x8xf32>
    %213 = arith.mulf %212, %210 : vector<2x8x8xf32>
    %214 = arith.addf %208, %213 : vector<2x8x8xf32>
    %c0_145 = arith.constant 0 : index
    %c3_146 = arith.constant 3 : index
    %c0_147 = arith.constant 0 : index
    %c0_148 = arith.constant 0 : index
    %215 = vector.load %arg4[%c0_145, %c3_146, %c0_147, %c0_148] : memref<2x4x9x128xf32, #tpu.memory_space<vmem>>, vector<2x1x8x8xf32>
    %216 = vector.shape_cast %215 : vector<2x1x8x8xf32> to vector<2x8x8xf32>
    %c31 = arith.constant 31 : index
    %217 = memref.load %arg2[%c31] : memref<54xf32, #tpu.memory_space<smem>>
    %218 = vector.broadcast %217 : f32 to vector<2x8x8xf32>
    %219 = arith.mulf %218, %216 : vector<2x8x8xf32>
    %220 = arith.addf %214, %219 : vector<2x8x8xf32>
    %c0_149 = arith.constant 0 : index
    %c2_150 = arith.constant 2 : index
    %c0_151 = arith.constant 0 : index
    %c1_152 = arith.constant 1 : index
    %221 = vector.load %arg4[%c0_149, %c2_150, %c0_151, %c1_152] : memref<2x4x9x128xf32, #tpu.memory_space<vmem>>, vector<2x1x8x8xf32>
    %222 = vector.shape_cast %221 : vector<2x1x8x8xf32> to vector<2x8x8xf32>
    %c32 = arith.constant 32 : index
    %223 = memref.load %arg2[%c32] : memref<54xf32, #tpu.memory_space<smem>>
    %224 = vector.broadcast %223 : f32 to vector<2x8x8xf32>
    %225 = arith.mulf %224, %222 : vector<2x8x8xf32>
    %226 = arith.addf %220, %225 : vector<2x8x8xf32>
    %c0_153 = arith.constant 0 : index
    %c0_154 = arith.constant 0 : index
    %c1_155 = arith.constant 1 : index
    %c0_156 = arith.constant 0 : index
    %227 = vector.load %arg4[%c0_153, %c0_154, %c1_155, %c0_156] : memref<2x4x9x128xf32, #tpu.memory_space<vmem>>, vector<2x1x8x8xf32>
    %228 = vector.shape_cast %227 : vector<2x1x8x8xf32> to vector<2x8x8xf32>
    %c33 = arith.constant 33 : index
    %229 = memref.load %arg2[%c33] : memref<54xf32, #tpu.memory_space<smem>>
    %230 = vector.broadcast %229 : f32 to vector<2x8x8xf32>
    %231 = arith.mulf %230, %228 : vector<2x8x8xf32>
    %232 = arith.addf %226, %231 : vector<2x8x8xf32>
    %c0_157 = arith.constant 0 : index
    %c1_158 = arith.constant 1 : index
    %c1_159 = arith.constant 1 : index
    %c0_160 = arith.constant 0 : index
    %233 = vector.load %arg4[%c0_157, %c1_158, %c1_159, %c0_160] : memref<2x4x9x128xf32, #tpu.memory_space<vmem>>, vector<2x1x8x8xf32>
    %234 = vector.shape_cast %233 : vector<2x1x8x8xf32> to vector<2x8x8xf32>
    %c34 = arith.constant 34 : index
    %235 = memref.load %arg2[%c34] : memref<54xf32, #tpu.memory_space<smem>>
    %236 = vector.broadcast %235 : f32 to vector<2x8x8xf32>
    %237 = arith.mulf %236, %234 : vector<2x8x8xf32>
    %238 = arith.addf %232, %237 : vector<2x8x8xf32>
    %c0_161 = arith.constant 0 : index
    %c0_162 = arith.constant 0 : index
    %c1_163 = arith.constant 1 : index
    %c1_164 = arith.constant 1 : index
    %239 = vector.load %arg4[%c0_161, %c0_162, %c1_163, %c1_164] : memref<2x4x9x128xf32, #tpu.memory_space<vmem>>, vector<2x1x8x8xf32>
    %240 = vector.shape_cast %239 : vector<2x1x8x8xf32> to vector<2x8x8xf32>
    %c35 = arith.constant 35 : index
    %241 = memref.load %arg2[%c35] : memref<54xf32, #tpu.memory_space<smem>>
    %242 = vector.broadcast %241 : f32 to vector<2x8x8xf32>
    %243 = arith.mulf %242, %240 : vector<2x8x8xf32>
    %244 = arith.addf %238, %243 : vector<2x8x8xf32>
    %cst_165 = arith.constant 384.149445 : f32
    %245 = vector.broadcast %cst_165 : f32 to vector<2x8x8xf32>
    %246 = arith.maximumf %244, %245 : vector<2x8x8xf32>
    %cst_166 = arith.constant 133.301559 : f32
    %247 = vector.broadcast %cst_166 : f32 to vector<2x8x8xf32>
    %248 = arith.minimumf %246, %247 : vector<2x8x8xf32>
    %c0_167 = arith.constant 0 : index
    %c3_168 = arith.constant 3 : index
    %c0_169 = arith.constant 0 : index
    %c0_170 = arith.constant 0 : index
    %249 = vector.load %arg5[%c0_167, %c3_168, %c0_169, %c0_170] : memref<2x6x8x8xf32, #tpu.memory_space<vmem>>, vector<2x1x8x8xf32>
    %250 = vector.shape_cast %249 : vector<2x1x8x8xf32> to vector<2x8x8xf32>
    %251 = vector.shape_cast %248 : vector<2x8x8xf32> to vector<2x1x8x8xf32>
    tpu.vector_store %arg5[%c0_167, %c3_168, %c0_169, %c0_170], %251 {strides = array<i32>} : memref<2x6x8x8xf32, #tpu.memory_space<vmem>>, vector<2x1x8x8xf32>,
    %c4_171 = arith.constant 4 : index
    %252 = memref.load %arg3[%c4_171] : memref<6xf32, #tpu.memory_space<smem>>
    %253 = vector.broadcast %252 : f32 to vector<2x8x8xf32>
    %c0_172 = arith.constant 0 : index
    %c0_173 = arith.constant 0 : index
    %c0_174 = arith.constant 0 : index
    %c0_175 = arith.constant 0 : index
    %254 = vector.load %arg4[%c0_172, %c0_173, %c0_174, %c0_175] : memref<2x4x9x128xf32, #tpu.memory_space<vmem>>, vector<2x1x8x8xf32>
    %255 = vector.shape_cast %254 : vector<2x1x8x8xf32> to vector<2x8x8xf32>
    %c36 = arith.constant 36 : index
    %256 = memref.load %arg2[%c36] : memref<54xf32, #tpu.memory_space<smem>>
    %257 = vector.broadcast %256 : f32 to vector<2x8x8xf32>
    %258 = arith.mulf %257, %255 : vector<2x8x8xf32>
    %259 = arith.addf %253, %258 : vector<2x8x8xf32>
    %c0_176 = arith.constant 0 : index
    %c1_177 = arith.constant 1 : index
    %c0_178 = arith.constant 0 : index
    %c0_179 = arith.constant 0 : index
    %260 = vector.load %arg4[%c0_176, %c1_177, %c0_178, %c0_179] : memref<2x4x9x128xf32, #tpu.memory_space<vmem>>, vector<2x1x8x8xf32>
    %261 = vector.shape_cast %260 : vector<2x1x8x8xf32> to vector<2x8x8xf32>
    %c37 = arith.constant 37 : index
    %262 = memref.load %arg2[%c37] : memref<54xf32, #tpu.memory_space<smem>>
    %263 = vector.broadcast %262 : f32 to vector<2x8x8xf32>
    %264 = arith.mulf %263, %261 : vector<2x8x8xf32>
    %265 = arith.addf %259, %264 : vector<2x8x8xf32>
    %c0_180 = arith.constant 0 : index
    %c0_181 = arith.constant 0 : index
    %c0_182 = arith.constant 0 : index
    %c1_183 = arith.constant 1 : index
    %266 = vector.load %arg4[%c0_180, %c0_181, %c0_182, %c1_183] : memref<2x4x9x128xf32, #tpu.memory_space<vmem>>, vector<2x1x8x8xf32>
    %267 = vector.shape_cast %266 : vector<2x1x8x8xf32> to vector<2x8x8xf32>
    %c38 = arith.constant 38 : index
    %268 = memref.load %arg2[%c38] : memref<54xf32, #tpu.memory_space<smem>>
    %269 = vector.broadcast %268 : f32 to vector<2x8x8xf32>
    %270 = arith.mulf %269, %267 : vector<2x8x8xf32>
    %271 = arith.addf %265, %270 : vector<2x8x8xf32>
    %c0_184 = arith.constant 0 : index
    %c2_185 = arith.constant 2 : index
    %c0_186 = arith.constant 0 : index
    %c0_187 = arith.constant 0 : index
    %272 = vector.load %arg4[%c0_184, %c2_185, %c0_186, %c0_187] : memref<2x4x9x128xf32, #tpu.memory_space<vmem>>, vector<2x1x8x8xf32>
    %273 = vector.shape_cast %272 : vector<2x1x8x8xf32> to vector<2x8x8xf32>
    %c39 = arith.constant 39 : index
    %274 = memref.load %arg2[%c39] : memref<54xf32, #tpu.memory_space<smem>>
    %275 = vector.broadcast %274 : f32 to vector<2x8x8xf32>
    %276 = arith.mulf %275, %273 : vector<2x8x8xf32>
    %277 = arith.addf %271, %276 : vector<2x8x8xf32>
    %c0_188 = arith.constant 0 : index
    %c3_189 = arith.constant 3 : index
    %c0_190 = arith.constant 0 : index
    %c0_191 = arith.constant 0 : index
    %278 = vector.load %arg4[%c0_188, %c3_189, %c0_190, %c0_191] : memref<2x4x9x128xf32, #tpu.memory_space<vmem>>, vector<2x1x8x8xf32>
    %279 = vector.shape_cast %278 : vector<2x1x8x8xf32> to vector<2x8x8xf32>
    %c40 = arith.constant 40 : index
    %280 = memref.load %arg2[%c40] : memref<54xf32, #tpu.memory_space<smem>>
    %281 = vector.broadcast %280 : f32 to vector<2x8x8xf32>
    %282 = arith.mulf %281, %279 : vector<2x8x8xf32>
    %283 = arith.addf %277, %282 : vector<2x8x8xf32>
    %c0_192 = arith.constant 0 : index
    %c2_193 = arith.constant 2 : index
    %c0_194 = arith.constant 0 : index
    %c1_195 = arith.constant 1 : index
    %284 = vector.load %arg4[%c0_192, %c2_193, %c0_194, %c1_195] : memref<2x4x9x128xf32, #tpu.memory_space<vmem>>, vector<2x1x8x8xf32>
    %285 = vector.shape_cast %284 : vector<2x1x8x8xf32> to vector<2x8x8xf32>
    %c41 = arith.constant 41 : index
    %286 = memref.load %arg2[%c41] : memref<54xf32, #tpu.memory_space<smem>>
    %287 = vector.broadcast %286 : f32 to vector<2x8x8xf32>
    %288 = arith.mulf %287, %285 : vector<2x8x8xf32>
    %289 = arith.addf %283, %288 : vector<2x8x8xf32>
    %c0_196 = arith.constant 0 : index
    %c0_197 = arith.constant 0 : index
    %c1_198 = arith.constant 1 : index
    %c0_199 = arith.constant 0 : index
    %290 = vector.load %arg4[%c0_196, %c0_197, %c1_198, %c0_199] : memref<2x4x9x128xf32, #tpu.memory_space<vmem>>, vector<2x1x8x8xf32>
    %291 = vector.shape_cast %290 : vector<2x1x8x8xf32> to vector<2x8x8xf32>
    %c42 = arith.constant 42 : index
    %292 = memref.load %arg2[%c42] : memref<54xf32, #tpu.memory_space<smem>>
    %293 = vector.broadcast %292 : f32 to vector<2x8x8xf32>
    %294 = arith.mulf %293, %291 : vector<2x8x8xf32>
    %295 = arith.addf %289, %294 : vector<2x8x8xf32>
    %c0_200 = arith.constant 0 : index
    %c1_201 = arith.constant 1 : index
    %c1_202 = arith.constant 1 : index
    %c0_203 = arith.constant 0 : index
    %296 = vector.load %arg4[%c0_200, %c1_201, %c1_202, %c0_203] : memref<2x4x9x128xf32, #tpu.memory_space<vmem>>, vector<2x1x8x8xf32>
    %297 = vector.shape_cast %296 : vector<2x1x8x8xf32> to vector<2x8x8xf32>
    %c43 = arith.constant 43 : index
    %298 = memref.load %arg2[%c43] : memref<54xf32, #tpu.memory_space<smem>>
    %299 = vector.broadcast %298 : f32 to vector<2x8x8xf32>
    %300 = arith.mulf %299, %297 : vector<2x8x8xf32>
    %301 = arith.addf %295, %300 : vector<2x8x8xf32>
    %c0_204 = arith.constant 0 : index
    %c0_205 = arith.constant 0 : index
    %c1_206 = arith.constant 1 : index
    %c1_207 = arith.constant 1 : index
    %302 = vector.load %arg4[%c0_204, %c0_205, %c1_206, %c1_207] : memref<2x4x9x128xf32, #tpu.memory_space<vmem>>, vector<2x1x8x8xf32>
    %303 = vector.shape_cast %302 : vector<2x1x8x8xf32> to vector<2x8x8xf32>
    %c44 = arith.constant 44 : index
    %304 = memref.load %arg2[%c44] : memref<54xf32, #tpu.memory_space<smem>>
    %305 = vector.broadcast %304 : f32 to vector<2x8x8xf32>
    %306 = arith.mulf %305, %303 : vector<2x8x8xf32>
    %307 = arith.addf %301, %306 : vector<2x8x8xf32>
    %cst_208 = arith.constant 384.149445 : f32
    %308 = vector.broadcast %cst_208 : f32 to vector<2x8x8xf32>
    %309 = arith.maximumf %307, %308 : vector<2x8x8xf32>
    %cst_209 = arith.constant 133.301559 : f32
    %310 = vector.broadcast %cst_209 : f32 to vector<2x8x8xf32>
    %311 = arith.minimumf %309, %310 : vector<2x8x8xf32>
    %c0_210 = arith.constant 0 : index
    %c4_211 = arith.constant 4 : index
    %c0_212 = arith.constant 0 : index
    %c0_213 = arith.constant 0 : index
    %312 = vector.load %arg5[%c0_210, %c4_211, %c0_212, %c0_213] : memref<2x6x8x8xf32, #tpu.memory_space<vmem>>, vector<2x1x8x8xf32>
    %313 = vector.shape_cast %312 : vector<2x1x8x8xf32> to vector<2x8x8xf32>
    %314 = vector.shape_cast %311 : vector<2x8x8xf32> to vector<2x1x8x8xf32>
    tpu.vector_store %arg5[%c0_210, %c4_211, %c0_212, %c0_213], %314 {strides = array<i32>} : memref<2x6x8x8xf32, #tpu.memory_space<vmem>>, vector<2x1x8x8xf32>,
    %c5_214 = arith.constant 5 : index
    %315 = memref.load %arg3[%c5_214] : memref<6xf32, #tpu.memory_space<smem>>
    %316 = vector.broadcast %315 : f32 to vector<2x8x8xf32>
    %c0_215 = arith.constant 0 : index
    %c0_216 = arith.constant 0 : index
    %c0_217 = arith.constant 0 : index
    %c0_218 = arith.constant 0 : index
    %317 = vector.load %arg4[%c0_215, %c0_216, %c0_217, %c0_218] : memref<2x4x9x128xf32, #tpu.memory_space<vmem>>, vector<2x1x8x8xf32>
    %318 = vector.shape_cast %317 : vector<2x1x8x8xf32> to vector<2x8x8xf32>
    %c45 = arith.constant 45 : index
    %319 = memref.load %arg2[%c45] : memref<54xf32, #tpu.memory_space<smem>>
    %320 = vector.broadcast %319 : f32 to vector<2x8x8xf32>
    %321 = arith.mulf %320, %318 : vector<2x8x8xf32>
    %322 = arith.addf %316, %321 : vector<2x8x8xf32>
    %c0_219 = arith.constant 0 : index
    %c1_220 = arith.constant 1 : index
    %c0_221 = arith.constant 0 : index
    %c0_222 = arith.constant 0 : index
    %323 = vector.load %arg4[%c0_219, %c1_220, %c0_221, %c0_222] : memref<2x4x9x128xf32, #tpu.memory_space<vmem>>, vector<2x1x8x8xf32>
    %324 = vector.shape_cast %323 : vector<2x1x8x8xf32> to vector<2x8x8xf32>
    %c46 = arith.constant 46 : index
    %325 = memref.load %arg2[%c46] : memref<54xf32, #tpu.memory_space<smem>>
    %326 = vector.broadcast %325 : f32 to vector<2x8x8xf32>
    %327 = arith.mulf %326, %324 : vector<2x8x8xf32>
    %328 = arith.addf %322, %327 : vector<2x8x8xf32>
    %c0_223 = arith.constant 0 : index
    %c0_224 = arith.constant 0 : index
    %c0_225 = arith.constant 0 : index
    %c1_226 = arith.constant 1 : index
    %329 = vector.load %arg4[%c0_223, %c0_224, %c0_225, %c1_226] : memref<2x4x9x128xf32, #tpu.memory_space<vmem>>, vector<2x1x8x8xf32>
    %330 = vector.shape_cast %329 : vector<2x1x8x8xf32> to vector<2x8x8xf32>
    %c47 = arith.constant 47 : index
    %331 = memref.load %arg2[%c47] : memref<54xf32, #tpu.memory_space<smem>>
    %332 = vector.broadcast %331 : f32 to vector<2x8x8xf32>
    %333 = arith.mulf %332, %330 : vector<2x8x8xf32>
    %334 = arith.addf %328, %333 : vector<2x8x8xf32>
    %c0_227 = arith.constant 0 : index
    %c2_228 = arith.constant 2 : index
    %c0_229 = arith.constant 0 : index
    %c0_230 = arith.constant 0 : index
    %335 = vector.load %arg4[%c0_227, %c2_228, %c0_229, %c0_230] : memref<2x4x9x128xf32, #tpu.memory_space<vmem>>, vector<2x1x8x8xf32>
    %336 = vector.shape_cast %335 : vector<2x1x8x8xf32> to vector<2x8x8xf32>
    %c48 = arith.constant 48 : index
    %337 = memref.load %arg2[%c48] : memref<54xf32, #tpu.memory_space<smem>>
    %338 = vector.broadcast %337 : f32 to vector<2x8x8xf32>
    %339 = arith.mulf %338, %336 : vector<2x8x8xf32>
    %340 = arith.addf %334, %339 : vector<2x8x8xf32>
    %c0_231 = arith.constant 0 : index
    %c3_232 = arith.constant 3 : index
    %c0_233 = arith.constant 0 : index
    %c0_234 = arith.constant 0 : index
    %341 = vector.load %arg4[%c0_231, %c3_232, %c0_233, %c0_234] : memref<2x4x9x128xf32, #tpu.memory_space<vmem>>, vector<2x1x8x8xf32>
    %342 = vector.shape_cast %341 : vector<2x1x8x8xf32> to vector<2x8x8xf32>
    %c49 = arith.constant 49 : index
    %343 = memref.load %arg2[%c49] : memref<54xf32, #tpu.memory_space<smem>>
    %344 = vector.broadcast %343 : f32 to vector<2x8x8xf32>
    %345 = arith.mulf %344, %342 : vector<2x8x8xf32>
    %346 = arith.addf %340, %345 : vector<2x8x8xf32>
    %c0_235 = arith.constant 0 : index
    %c2_236 = arith.constant 2 : index
    %c0_237 = arith.constant 0 : index
    %c1_238 = arith.constant 1 : index
    %347 = vector.load %arg4[%c0_235, %c2_236, %c0_237, %c1_238] : memref<2x4x9x128xf32, #tpu.memory_space<vmem>>, vector<2x1x8x8xf32>
    %348 = vector.shape_cast %347 : vector<2x1x8x8xf32> to vector<2x8x8xf32>
    %c50 = arith.constant 50 : index
    %349 = memref.load %arg2[%c50] : memref<54xf32, #tpu.memory_space<smem>>
    %350 = vector.broadcast %349 : f32 to vector<2x8x8xf32>
    %351 = arith.mulf %350, %348 : vector<2x8x8xf32>
    %352 = arith.addf %346, %351 : vector<2x8x8xf32>
    %c0_239 = arith.constant 0 : index
    %c0_240 = arith.constant 0 : index
    %c1_241 = arith.constant 1 : index
    %c0_242 = arith.constant 0 : index
    %353 = vector.load %arg4[%c0_239, %c0_240, %c1_241, %c0_242] : memref<2x4x9x128xf32, #tpu.memory_space<vmem>>, vector<2x1x8x8xf32>
    %354 = vector.shape_cast %353 : vector<2x1x8x8xf32> to vector<2x8x8xf32>
    %c51 = arith.constant 51 : index
    %355 = memref.load %arg2[%c51] : memref<54xf32, #tpu.memory_space<smem>>
    %356 = vector.broadcast %355 : f32 to vector<2x8x8xf32>
    %357 = arith.mulf %356, %354 : vector<2x8x8xf32>
    %358 = arith.addf %352, %357 : vector<2x8x8xf32>
    %c0_243 = arith.constant 0 : index
    %c1_244 = arith.constant 1 : index
    %c1_245 = arith.constant 1 : index
    %c0_246 = arith.constant 0 : index
    %359 = vector.load %arg4[%c0_243, %c1_244, %c1_245, %c0_246] : memref<2x4x9x128xf32, #tpu.memory_space<vmem>>, vector<2x1x8x8xf32>
    %360 = vector.shape_cast %359 : vector<2x1x8x8xf32> to vector<2x8x8xf32>
    %c52 = arith.constant 52 : index
    %361 = memref.load %arg2[%c52] : memref<54xf32, #tpu.memory_space<smem>>
    %362 = vector.broadcast %361 : f32 to vector<2x8x8xf32>
    %363 = arith.mulf %362, %360 : vector<2x8x8xf32>
    %364 = arith.addf %358, %363 : vector<2x8x8xf32>
    %c0_247 = arith.constant 0 : index
    %c0_248 = arith.constant 0 : index
    %c1_249 = arith.constant 1 : index
    %c1_250 = arith.constant 1 : index
    %365 = vector.load %arg4[%c0_247, %c0_248, %c1_249, %c1_250] : memref<2x4x9x128xf32, #tpu.memory_space<vmem>>, vector<2x1x8x8xf32>
    %366 = vector.shape_cast %365 : vector<2x1x8x8xf32> to vector<2x8x8xf32>
    %c53 = arith.constant 53 : index
    %367 = memref.load %arg2[%c53] : memref<54xf32, #tpu.memory_space<smem>>
    %368 = vector.broadcast %367 : f32 to vector<2x8x8xf32>
    %369 = arith.mulf %368, %366 : vector<2x8x8xf32>
    %370 = arith.addf %364, %369 : vector<2x8x8xf32>
    %cst_251 = arith.constant 384.149445 : f32
    %371 = vector.broadcast %cst_251 : f32 to vector<2x8x8xf32>
    %372 = arith.maximumf %370, %371 : vector<2x8x8xf32>
    %cst_252 = arith.constant 133.301559 : f32
    %373 = vector.broadcast %cst_252 : f32 to vector<2x8x8xf32>
    %374 = arith.minimumf %372, %373 : vector<2x8x8xf32>
    %c0_253 = arith.constant 0 : index
    %c5_254 = arith.constant 5 : index
    %c0_255 = arith.constant 0 : index
    %c0_256 = arith.constant 0 : index
    %375 = vector.load %arg5[%c0_253, %c5_254, %c0_255, %c0_256] : memref<2x6x8x8xf32, #tpu.memory_space<vmem>>, vector<2x1x8x8xf32>
    %376 = vector.shape_cast %375 : vector<2x1x8x8xf32> to vector<2x8x8xf32>
    %377 = vector.shape_cast %374 : vector<2x8x8xf32> to vector<2x1x8x8xf32>
    tpu.vector_store %arg5[%c0_253, %c5_254, %c0_255, %c0_256], %377 {strides = array<i32>} : memref<2x6x8x8xf32, #tpu.memory_space<vmem>>, vector<2x1x8x8xf32>,
    return
  }
  func.func @transform_0(%arg0: i32, %arg1: i32) -> i32 {
    %c0_i32 = arith.constant 0 : i32
    %c0_i32_0 = arith.constant 0 : i32
    return %c0_i32 : i32
  }
  func.func @transform_1(%arg0: i32, %arg1: i32) -> i32 {
    %c0_i32 = arith.constant 0 : i32
    %c0_i32_0 = arith.constant 0 : i32
    return %c0_i32 : i32
  }
  func.func @transform_2(%arg0: i32, %arg1: i32) -> (i32, i32, i32, i32) {
    %c0_i32 = arith.constant 0 : i32
    %c0_i32_0 = arith.constant 0 : i32
    %c0_i32_1 = arith.constant 0 : i32
    return %arg0, %arg1, %c0_i32, %c0_i32_0 : i32, i32, i32, i32
  }
  func.func @transform_3(%arg0: i32, %arg1: i32) -> (i32, i32, i32, i32) {
    %c0_i32 = arith.constant 0 : i32
    %c0_i32_0 = arith.constant 0 : i32
    %c0_i32_1 = arith.constant 0 : i32
    return %arg0, %c0_i32, %arg1, %c0_i32_0 : i32, i32, i32, i32
  }
}

</mosaic_0001>

<bundles_post_ra>
// kernel: conv_clamp.1
= control target key start
LH: loop header
LB: loop body
LE: loop exit
PB: predicated region body
PF: predicated region fallthrough
CT: control target
= control target key end

     0   :  { %8 = vsyncpa [#allocation4], 0  ;;  %s1300_s0 = inlined_call_operand.vmem [shape: f32[54], index: 0, kind: input, shape index: {}]   ;;  %s1301_s1 = inlined_call_operand.vmem [shape: f32[6], index: 1, kind: input, shape index: {}]   ;;  %s1302_s2 = inlined_call_operand.vmem [shape: f32[2,4,9,128], index: 2, kind: input, shape index: {}]   ;;  %s1303_s3 = inlined_call_operand.hbm [shape: f32[2,6,8,8], index: 3, kind: output, shape index: {}]  }
   0x1   :  { %9 = vsyncpa [#allocation6], 0 }
   0x2   :  { %10 = vsyncpa [#allocation3], 0  ;;  %s16_s14 = sshll.u32 %s1300_s0, 4  ;;  %s25_s17 = sshll.u32 %s1301_s1, 4  ;;  %s17_s14 = int_to_ptr.vmem [resolvable:$true] %s16_s14  ;;  %s26_s17 = int_to_ptr.vmem [resolvable:$true] %s25_s17 }
   0x3   :  { %s823_s18 = smov [#allocation2]   ;;  %s824_s19 = smov [#allocation5]  }
   0x4   :  { %19 = dma.vmem_to_smem %s17_s14, 16, %s823_s18, [#allocation4]  }
   0x5   :  { %28 = dma.vmem_to_smem %s26_s17, 16, %s824_s19, [#allocation6]  }
   0x6   :  { %817 = dma.done.wait [#allocation4], 16  }
   0x7   :  { %818 = vsyncadd [#allocation4], 4294967280 }
   0x8   :  { %819 = dma.done.wait [#allocation6], 16  }
   0x9   :  { %820 = vsyncadd [#allocation6], 4294967280 }
   0xa   :  { %39 = sfence }
   0xb   :  { %s672_s20 = sld [smem:[#allocation2 + $0x8]]  ;;  %v858_v0 = vld [vmem:[%s1302_s2 + $0x1] sm:$0xff]  ;;  %s825_s27 = smov 127   ;;  %vm139_vm0 = vcmask 64512  }
   0xc   :  { %s667_s21 = sld [smem:[#allocation2 + $0x5]]  ;;  %v863_v2 = vld [vmem:[%s1302_s2 + $0x20] sm:$0xff] }
   0xd   :  { %s660_s0 = sld [smem:[#allocation2 + $0x2]]  ;;  %v869_v5 = vld [vmem:[%s1302_s2] sm:$0xff] }
   0xe   :  { %v876_v7 = vld [vmem:[%s1302_s2 + $0x41] sm:$0xff]  ;;  %s685_s30 = sld [smem:[#allocation2 + $0xe]] }
   0xf   :  { %v883_v10 = vld [vmem:[%s1302_s2 + $0x60] sm:$0xff]  ;;  %s678_s6 = sld [smem:[#allocation2 + $0xb]] }
  0x10   :  { %v890_v12 = vld [vmem:[%s1302_s2 + $0x40] sm:$0xff]  ;;  %s690_s9 = sld [smem:[#allocation2 + $0x11]] }
  0x11   :  { %v122_v1 = vstv %s672_s20  ;;  %s703_s10 = sld [smem:[#allocation2 + $0x17]] }
  0x12   :  { %v123_v3 = vmul.f32 %v122_v1, %v858_v0  ;;  %v92_v4 = vstv %s667_s21  ;;  %v124_v11 = vmul.f32 %v122_v1, %v876_v7  ;;  %s696_s11 = sld [smem:[#allocation2 + $0x14]] }
  0x13   :  { %v93_v6 = vmul.f32 %v863_v2, %v92_v4  ;;  %v60_v8 = vstv %s660_s0  ;;  %v94_v13 = vmul.f32 %v883_v10, %v92_v4  ;;  %s714_s12 = sld [smem:[#allocation2 + $0x1d]] }
  0x14   :  { %127 = vrot.lane.b32.xlu2 %v123_v3, %s825_s27  ;;  %v61_v9 = vmul.f32 %v60_v8, %v869_v5  ;;  %v62_v14 = vmul.f32 %v60_v8, %v890_v12  ;;  %v191_v15 = vstv %s685_s30  ;;  %s908_s13 = sld [smem:[#allocation2 + $0x1a]] }
  0x15   :  { %97 = vrot.lane.b32.xlu1 %v93_v6, %s825_s27  ;;  %v161_v16 = vstv %s678_s6  ;;  %v192_v17 = vmul.f32 %v863_v2, %v191_v15  ;;  %v193_v23 = vmul.f32 %v883_v10, %v191_v15  ;;  %s732_s14 = sld [smem:[#allocation2 + $0x26]]  ;;  %v993_v6 = vld [vmem:[%s1302_s2 + $0x10] sm:$0xff] }
  0x16   :  { %65 = vrot.lane.b32.xlu0 %v61_v9, %s825_s27  ;;  %v163_v18 = vmul.f32 %v161_v16, %v890_v12  ;;  %v162_v19 = vmul.f32 %v161_v16, %v869_v5  ;;  %v221_v20 = vstv %s690_s9  ;;  %s721_s15 = sld [smem:[#allocation2 + $0x20]] }
  0x17   :  { %v223_v21 = vmul.f32 %v221_v20, %v876_v7  ;;  %v222_v22 = vmul.f32 %v221_v20, %v858_v0  ;;  %v290_v24 = vstv %s703_s10  ;;  %s750_s16 = sld [smem:[#allocation2 + $0x2f]] }
  0x18   :  { %v260_v25 = vstv %s696_s11  ;;  %v291_v26 = vmul.f32 %v863_v2, %v290_v24  ;;  %v292_v33 = vmul.f32 %v883_v10, %v290_v24  ;;  %s739_s17 = sld [smem:[#allocation2 + $0x29]] }
  0x19   :  { %v262_v27 = vmul.f32 %v260_v25, %v890_v12  ;;  %v261_v28 = vmul.f32 %v260_v25, %v869_v5  ;;  %v359_v29 = vstv %s714_s12  ;;  %s757_s18 = sld [smem:[#allocation2 + $0x32]] }
  0x1a   :  { %v320_v30 = vstv %s908_s13  ;;  %v360_v31 = vmul.f32 %v359_v29, %v869_v5  ;;  %v361_v37 = vmul.f32 %v359_v29, %v890_v12  ;;  %s726_s19 = sld [smem:[#allocation2 + $0x23]]  ;;  %v1041_v29 = vld [vmem:[%s1302_s2 + $0x30] sm:$0xff] }
  0x1b   :  { %v321_v32 = vmul.f32 %v320_v30, %v858_v0  ;;  %v458_v34 = vstv %s732_s14  ;;  %s744_s20 = sld [smem:[#allocation2 + $0x2c]]  ;;  %v322_v48 = vmul.f32 %v320_v30, %v876_v7 }
  0x1c   :  { %129 = vrot.lane.b32.xlu2 %v124_v11, %s825_s27  ;;  %v460_v35 = vmul.f32 %v458_v34, %v890_v12  ;;  %v459_v36 = vmul.f32 %v458_v34, %v869_v5  ;;  %v389_v38 = vstv %s721_s15  ;;  %s762_s21 = sld [smem:[#allocation2 + $0x35]] }
  0x1d   :  { %99 = vrot.lane.b32.xlu1 %v94_v13, %s825_s27  ;;  %v557_v39 = vstv %s750_s16  ;;  %v390_v40 = vmul.f32 %v863_v2, %v389_v38  ;;  %v391_v46 = vmul.f32 %v883_v10, %v389_v38  ;;  %s962_s22 = sld [smem:[#allocation2]] }
  0x1e   :  { %67 = vrot.lane.b32.xlu0 %v62_v14, %s825_s27  ;;  %v559_v41 = vmul.f32 %v557_v39, %v890_v12  ;;  %v558_v42 = vmul.f32 %v557_v39, %v869_v5  ;;  %v488_v43 = vstv %s739_s17  ;;  %s964_s23 = sld [smem:[#allocation2 + $0x1b]] }
  0x1f   :  { %v490_v44 = vmul.f32 %v883_v10, %v488_v43  ;;  %v489_v45 = vmul.f32 %v863_v2, %v488_v43  ;;  %v587_v47 = vstv %s757_s18  ;;  %s966_s0 = sld [smem:[#allocation2 + $0x24]] }
  0x20   :  { %v589_v49 = vmul.f32 %v883_v10, %v587_v47  ;;  %v588_v50 = vmul.f32 %v863_v2, %v587_v47  ;;  %v419_v51 = vstv %s726_s19  ;;  %s970_s1 = sld [smem:[#allocation2 + $0x1]]  ;;  %v1073_v47 = vld [vmem:[%s1302_s2 + $0x11] sm:$0xff] }
  0x21   :  { %v518_v52 = vstv %s744_s20  ;;  %v421_v54 = vmul.f32 %v419_v51, %v876_v7  ;;  %v420_v55 = vmul.f32 %v419_v51, %v858_v0  ;;  %s972_s24 = sld [smem:[#allocation5]] }
  0x22   :  { %v519_v53 = vmul.f32 %v518_v52, %v858_v0  ;;  %v617_v56 = vstv %s762_s21  ;;  %v520_v59 = vmul.f32 %v518_v52, %v876_v7  ;;  %s974_s25 = sld [smem:[#allocation5 + $0x3]]  ;;  %s643_s21 = sshll.u32 %s1303_s3, 4  ;;  %s644_s21 = int_to_ptr.hbm [resolvable:$true] %s643_s21 }
  0x23   :  { %v619_v57 = vmul.f32 %v617_v56, %v876_v7  ;;  %v618_v58 = vmul.f32 %v617_v56, %v858_v0  ;;  %v45_v62 = vstv %s962_s22  ;;  %s977_s26 = sld [smem:[#allocation2 + $0x1c]]  ;;  %s827_s22 = smov 128  }
  0x24   :  { %196 = vrot.lane.b32.xlu2 %v192_v17, %s825_s27  ;;  %s981_s28 = sld [smem:[#allocation2 + $0x3]]  ;;  %v46_v1 = vmul.f32 %v45_v62, %v869_v5  ;;  %v345_v3 = vstv %s964_s23  ;;  %v47_v24 = vmul.f32 %v45_v62, %v890_v12 }
  0x25   :  { %168 = vrot.lane.b32.xlu1 %v163_v18, %s825_s27  ;;  %v444_v4 = vstv %s966_s0  ;;  %s988_s29 = sld [smem:[#allocation2 + $0x25]]  ;;  %v346_v11 = vmul.f32 %v345_v3, %v869_v5 }
  0x26   :  { %166 = vrot.lane.b32.xlu0 %v162_v19, %s825_s27  ;;  %v54_v8 = vstv %s970_s1  ;;  %s996_s5 = sld [smem:[#allocation2 + $0x4]]  ;;  %v446_v13 = vmul.f32 %v444_v4, %v890_v12 }
  0x27   :  { %v41_v9 = vstv %s972_s24  ;;  %s999_s6 = sld [smem:[#allocation2 + $0x9]]  ;;  %v55_v14 = vmul.f32 %v993_v6, %v54_v8 }
  0x28   :  { %s1007_s7 = sld [smem:[#allocation2 + $0x6]]  ;;  %v48_v15 = vadd.f32 %v46_v1, %v41_v9  ;;  %v341_v16 = vstv %s974_s25 }
  0x29   :  { %s1010_s8 = sld [smem:[#allocation5 + $0x1]]  ;;  %v353_v17 = vstv %s977_s26 }
  0x2a   :  { %s1014_s9 = sld [smem:[#allocation2 + $0xa]]  ;;  %v77_v19 = vstv %s981_s28  ;;  %v57_v25 = vadd.f32 %v55_v14, %v48_v15 }
  0x2b   :  { %s1020_s10 = sld [smem:[#allocation2 + $0x7]]  ;;  %v79_v1 = vmul.f32 %v883_v10, %v77_v19 }
  0x2c   :  { %228 = vrot.lane.b32.xlu2 %v223_v21, %s825_s27  ;;  %v348_v21 = vadd.f32 %v346_v11, %v341_v16  ;;  %s1036_s13 = sld [smem:[#allocation2 + $0xf]]  ;;  %v86_v30 = vstv %s996_s5 }
  0x2d   :  { %226 = vrot.lane.b32.xlu1 %v222_v22, %s825_s27  ;;  %v354_v22 = vmul.f32 %v993_v6, %v353_v17  ;;  %v147_v34 = vstv %s999_s6  ;;  %s1051_s16 = sld [smem:[#allocation2 + $0x12]] }
  0x2e   :  { %198 = vrot.lane.b32.xlu0 %v193_v23, %s825_s27  ;;  %s1053_s17 = sld [smem:[#allocation2 + $0x1e]] }
  0x2f   :  { %s1061_s18 = sld [smem:[#allocation2 + $0xc]] }
  0x30   :  { %s1065_s19 = sld [smem:[#allocation2 + $0x1f]] }
  0x31   :  { %s1068_s20 = sld [smem:[#allocation2 + $0x2d]] }
  0x32   :  { %s1079_s1 = sld [smem:[#allocation2 + $0xd]] }
  0x33   :  { %s1088_s30 = sld [smem:[#allocation2 + $0x27]] }
  0x34   :  { %295 = vrot.lane.b32.xlu2 %v291_v26, %s825_s27  ;;  %v1033_v26 = vld [vmem:[%s1302_s2 + $0x50] sm:$0xff]  ;;  %s1093_s4 = sld [smem:[#allocation2 + $0x10]] }
  0x35   :  { %267 = vrot.lane.b32.xlu1 %v262_v27, %s825_s27  ;;  %v452_v27 = vstv %s988_s29  ;;  %v56_v39 = vmul.f32 %v1033_v26, %v54_v8  ;;  %s1097_s5 = sld [smem:[#allocation5 + $0x2]]  ;;  %s826_s29 = smov [#allocation7]  }
  0x36   :  { %265 = vrot.lane.b32.xlu0 %v261_v28, %s825_s27  ;;  %s1152_s11 = sld [smem:[#allocation2 + $0x15]] }
  0x37   :  { %s1166_s12 = sld [smem:[#allocation2 + $0x16]] }
  0x38   :  { %s1180_s14 = sld [smem:[#allocation2 + $0x18]] }
  0x39   :  { %s1183_s15 = sld [smem:[#allocation2 + $0x19]] }
  0x3a   :  { %s1226_s0 = sld [smem:[#allocation2 + $0x31]] }
  0x3b   :  { %s1257_s23 = sld [smem:[#allocation2 + $0x33]] }
  0x3c   :  { %364 = vrot.lane.b32.xlu2 %v360_v31, %s825_s27  ;;  %v1044_v31 = vadd.f32 %v354_v22, %v348_v21  ;;  %s1259_s25 = sld [smem:[#allocation2 + $0x21]] }
  0x3d   :  { %325 = vrot.lane.b32.xlu1 %v321_v32, %s825_s27  ;;  %v454_v32 = vmul.f32 %v1033_v26, %v452_v27  ;;  %s1265_s26 = sld [smem:[#allocation2 + $0x34]] }
  0x3e   :  { %297 = vrot.lane.b32.xlu0 %v292_v33, %s825_s27  ;;  %v78_v33 = vmul.f32 %v863_v2, %v77_v19  ;;  %v1104_v19 = vld [vmem:[%s1302_s2 + $0x51] sm:$0xff] }
  0x44   :  { %465 = vrot.lane.b32.xlu2 %v460_v35, %s825_s27 }
  0x45   :  { %463 = vrot.lane.b32.xlu1 %v459_v36, %s825_s27 }
  0x46   :  { %366 = vrot.lane.b32.xlu0 %v361_v37, %s825_s27  ;;  %v87_v37 = vmul.f32 %v1041_v29, %v86_v30 }
  0x4c   :  { %394 = vrot.lane.b32.xlu2 %v390_v40, %s825_s27  ;;  %v49_v40 = vadd.f32 %v47_v24, %v41_v9  ;;  %v375_v9 = vstv %s1053_s17  ;;  %s641_s17 = sshll.u32 %s826_s29, 4  ;;  %s642_s17 = int_to_ptr.vmem [resolvable:$true] %s641_s17 }
  0x4d   :  { %564 = vrot.lane.b32.xlu1 %v559_v41, %s825_s27  ;;  %v108_v41 = vstv %s1007_s7 }
  0x4e   :  { %562 = vrot.lane.b32.xlu0 %v558_v42, %s825_s27  ;;  %v149_v42 = vmul.f32 %v147_v34, %v890_v12  ;;  %v58_v52 = vadd.f32 %v56_v39, %v49_v40  ;;  %v110_v14 = vmul.f32 %v108_v41, %v876_v7 }
  0x54   :  { %495 = vrot.lane.b32.xlu2 %v490_v44, %s825_s27  ;;  %v143_v44 = vstv %s1010_s8  ;;  %s1106_s8 = sld [smem:[#allocation2 + $0x13]] }
  0x55   :  { %493 = vrot.lane.b32.xlu1 %v489_v45, %s825_s27  ;;  %v155_v45 = vstv %s1014_s9  ;;  %v151_v56 = vadd.f32 %v149_v42, %v143_v44  ;;  %s1115_s9 = sld [smem:[#allocation2 + $0x28]] }
  0x56   :  { %396 = vrot.lane.b32.xlu0 %v391_v46, %s825_s27  ;;  %v148_v46 = vmul.f32 %v147_v34, %v869_v5  ;;  %v383_v34 = vstv %s1065_s19 }
  0x58   :  { %v150_v11 = vadd.f32 %v148_v46, %v143_v44  ;;  %v185_v44 = vstv %s1079_s1  ;;  %s828_s1 = smov 8  }
  0x5c   :  { %327 = vrot.lane.b32.xlu2 %v322_v48, %s825_s27  ;;  %v116_v48 = vstv %s1020_s10  ;;  %s1126_s10 = sld [smem:[#allocation2 + $0x2e]] }
  0x5d   :  { %594 = vrot.lane.b32.xlu1 %v589_v49, %s825_s27 }
  0x5e   :  { %592 = vrot.lane.b32.xlu0 %v588_v50, %s825_s27  ;;  %v109_v50 = vmul.f32 %v108_v41, %v858_v0 }
  0x64   :  { %523 = vrot.lane.b32.xlu2 %v519_v53, %s825_s27  ;;  %v207_v53 = vstv %s1036_s13  ;;  %s1174_s13 = sld [smem:[#allocation2 + $0x2a]] }
  0x65   :  { %426 = vrot.lane.b32.xlu1 %v421_v54, %s825_s27 }
  0x66   :  { %424 = vrot.lane.b32.xlu0 %v420_v55, %s825_s27  ;;  %v1085_v55 = vld [vmem:[%s1302_s2 + $0x70] sm:$0xff]  ;;  %s1121_s2 = sld [smem:[#allocation5 + $0x5]] }
  0x67   :  { %v88_v21 = vmul.f32 %v1085_v55, %v86_v30 }
  0x6c   :  { %624 = vrot.lane.b32.xlu2 %v619_v57, %s825_s27  ;;  %v157_v57 = vmul.f32 %v1033_v26, %v155_v45 }
  0x6d   :  { %622 = vrot.lane.b32.xlu1 %v618_v58, %s825_s27  ;;  %v246_v58 = vstv %s1051_s16  ;;  %s1187_s16 = sld [smem:[#allocation2 + $0x2b]] }
  0x6e   :  { %v959_v60 = vpop.permute.xlu2 %127  ;;  %525 = vrot.lane.b32.xlu0 %v520_v59, %s825_s27  ;;  %s979_s27 = sld [smem:[#allocation5 + $0x4]]  ;;  %v117_v59 = vmul.f32 %v1073_v47, %v116_v48  ;;  %v248_v24 = vmul.f32 %v246_v58, %v890_v12 }
  0x74   :  { %v440_v18 = vstv %s979_s27  ;;  %s725_s27 = sld [smem:[#allocation2 + $0x22]] }
  0x75   :  { %v448_v23 = vadd.f32 %v446_v13, %v440_v18  ;;  %v156_v13 = vmul.f32 %v993_v6, %v155_v45 }
  0x76   :  { %v968_v61 = vpop.permute.xlu2 %129 }
  0x77   :  { %v1055_v36 = vadd.f32 %v454_v32, %v448_v23  ;;  %v1111_v23 = vmul.f32 %v207_v53, %v858_v0  ;;  %v158_v40 = vadd.f32 %v156_v13, %v150_v11  ;;  %v215_v13 = vstv %s1093_s4 }
  0x7e   :  { %v983_v63 = vpop.permute.xlu2 %196 }
  0x86   :  { %v1018_v20 = vpop.permute.xlu2 %228 }
  0x87   :  { %v98_v28 = vpop.permute.xlu1 %97 }
  0x88   :  { %v66_v35 = vpop.permute.xlu0 %65 }
  0x89   :  { %v71_v38 = vadd.f32 %v66_v35, %v57_v25  ;;  %v159_v25 = vadd.f32 %v157_v57, %v151_v56  ;;  %v247_v35 = vmul.f32 %v246_v58, %v869_v5  ;;  %v186_v58 = vmul.f32 %v1041_v29, %v185_v44 }
  0x8b   :  { %v80_v43 = vadd.f32 %v78_v33, %v71_v38  ;;  %v376_v33 = vmul.f32 %v863_v2, %v375_v9  ;;  %v118_v38 = vmul.f32 %v1104_v19, %v116_v48  ;;  %v384_v48 = vmul.f32 %v1041_v29, %v383_v34 }
  0x8d   :  { %v89_v51 = vadd.f32 %v87_v37, %v80_v43  ;;  %v543_v37 = vstv %s1068_s20 }
  0x8e   :  { %v1076_v49 = vpop.permute.xlu2 %295 }
  0x8f   :  { %v100_v54 = vpop.permute.xlu1 %99  ;;  %v103_v62 = vadd.f32 %v98_v28, %v89_v51  ;;  %v177_v28 = vstv %s1061_s18  ;;  %v474_v51 = vstv %s1088_s30  ;;  %s1219_s18 = sld [smem:[#allocation2 + $0x30]] }
  0x90   :  { %v68_v8 = vpop.permute.xlu0 %67  ;;  %v179_v45 = vmul.f32 %v883_v10, %v177_v28 }
  0x91   :  { %v111_v15 = vadd.f32 %v109_v50, %v103_v62  ;;  %v72_v22 = vadd.f32 %v68_v8, %v58_v52  ;;  %v178_v50 = vmul.f32 %v863_v2, %v177_v28  ;;  %v187_v62 = vmul.f32 %v1085_v55, %v185_v44 }
  0x93   :  { %v119_v30 = vadd.f32 %v117_v59, %v111_v15  ;;  %v81_v32 = vadd.f32 %v79_v1, %v72_v22  ;;  %v482_v22 = vstv %s1115_s9 }
  0x94   :  { %v484_v44 = vmul.f32 %v1085_v55, %v482_v22 }
  0x95   :  { %v133_v41 = vadd.f32 %v959_v60, %v119_v30  ;;  %v90_v42 = vadd.f32 %v88_v21, %v81_v32  ;;  %v242_v21 = vstv %s1097_s5  ;;  %v254_v32 = vstv %s1106_s8 }
  0x96   :  { %v365_v39 = vpop.permute.xlu2 %364 }
  0x97   :  { %v370_v43 = vadd.f32 %v365_v39, %v1044_v31  ;;  %v169_v46 = vpop.permute.xlu1 %168  ;;  %v135_v52 = vmax.f32 %v133_v41, 384.14944  ;;  %v104_v56 = vadd.f32 %v100_v54, %v90_v42  ;;  %v544_v31 = vmul.f32 %v543_v37, %v869_v5 }
  0x98   :  { %v173_v57 = vadd.f32 %v169_v46, %v159_v25  ;;  %v167_v59 = vpop.permute.xlu0 %166  ;;  %v476_v54 = vmul.f32 %v883_v10, %v474_v51  ;;  %v209_v39 = vmul.f32 %v207_v53, %v876_v7  ;;  %v551_v41 = vstv %s1126_s10 }
  0x99   :  { %v378_v60 = vadd.f32 %v376_v33, %v370_v43  ;;  %v137_v1 = vmin.f32 %v135_v52, 133.30156  ;;  %v112_v8 = vadd.f32 %v110_v14, %v104_v56  ;;  %v172_v11 = vadd.f32 %v167_v59, %v158_v40 }
  0x9a   :  { %v181_v28 = vadd.f32 %v179_v45, %v173_v57  ;;  %v216_v33 = vmul.f32 %v1073_v47, %v215_v13  ;;  %v539_v40 = vstv %s1121_s2  ;;  %v250_v46 = vadd.f32 %v248_v24, %v242_v21 }
  0x9b   :  { %v1146_v15 = vadd.f32 %v384_v48, %v378_v60  ;;  %140 = vst.msk [vmem:[#allocation7] sm:$0xff] %vm139_vm0, %v137_v1  ;;  %v120_v25 = vadd.f32 %v118_v38, %v112_v8  ;;  %v180_v30 = vadd.f32 %v178_v50, %v172_v11  ;;  %v256_v50 = vmul.f32 %v1033_v26, %v254_v32 }
  0x9c   :  { %v546_v48 = vadd.f32 %v544_v31, %v539_v40  ;;  %v552_v53 = vmul.f32 %v993_v6, %v551_v41  ;;  %v189_v60 = vadd.f32 %v187_v62, %v181_v28  ;;  %v249_v57 = vadd.f32 %v247_v35, %v242_v21 }
  0x9d   :  { %v134_v42 = vadd.f32 %v968_v61, %v120_v25  ;;  %v188_v43 = vadd.f32 %v186_v58, %v180_v30  ;;  %v255_v58 = vmul.f32 %v993_v6, %v254_v32  ;;  %v258_v35 = vadd.f32 %v256_v50, %v250_v46 }
  0x9e   :  { %v466_v14 = vpop.permute.xlu2 %465  ;;  %v1178_v59 = vadd.f32 %v552_v53, %v546_v48  ;;  %v306_v48 = vstv %s1180_s14 }
  0x9f   :  { %v470_v38 = vadd.f32 %v466_v14, %v1055_v36  ;;  %v227_v45 = vpop.permute.xlu1 %226  ;;  %v136_v52 = vmax.f32 %v134_v42, 384.14944  ;;  %v202_v61 = vadd.f32 %v983_v63, %v188_v43  ;;  %v217_v36 = vmul.f32 %v1104_v19, %v215_v13 }
  0xa0   :  { %v199_v24 = vpop.permute.xlu0 %198  ;;  %v276_v13 = vstv %s1152_s11  ;;  %v284_v14 = vstv %s1166_s12  ;;  %v504_v43 = vstv %s1174_s13 }
  0xa1   :  { %v478_v56 = vadd.f32 %v476_v54, %v470_v38  ;;  %v138_v31 = vmin.f32 %v136_v52, 133.30156  ;;  %v210_v1 = vadd.f32 %v1111_v23, %v202_v61  ;;  %v203_v8 = vadd.f32 %v199_v24, %v189_v60 }
  0xa2   :  { %v257_v23 = vadd.f32 %v255_v58, %v249_v57  ;;  %v278_v28 = vmul.f32 %v883_v10, %v276_v13  ;;  %v277_v32 = vmul.f32 %v863_v2, %v276_v13  ;;  %v285_v46 = vmul.f32 %v1041_v29, %v284_v14 }
  0xa3   :  { %v486_v63 = vadd.f32 %v484_v44, %v478_v56  ;;  %141 = vst.msk [vmem:[#allocation7 + $0x30] sm:$0xff] %vm139_vm0, %v138_v31  ;;  %v218_v62 = vadd.f32 %v216_v33, %v210_v1  ;;  %v211_v11 = vadd.f32 %v209_v39, %v203_v8  ;;  %v506_v53 = vmul.f32 %v504_v43, %v876_v7 }
  0xa4   :  { %v314_v52 = vstv %s1183_s15  ;;  %v286_v56 = vmul.f32 %v1085_v55, %v284_v14  ;;  %v307_v57 = vmul.f32 %v306_v48, %v858_v0 }
  0xa5   :  { %v232_v21 = vadd.f32 %v227_v45, %v218_v62  ;;  %v219_v25 = vadd.f32 %v217_v36, %v211_v11  ;;  %v512_v36 = vstv %s1187_s16  ;;  %v315_v1 = vmul.f32 %v1073_v47, %v314_v52 }
  0xa6   :  { %v1189_v54 = vpop.permute.xlu2 %394  ;;  %v514_v62 = vmul.f32 %v1104_v19, %v512_v36 }
  0xa7   :  { %v268_v30 = vpop.permute.xlu1 %267  ;;  %v234_v33 = vmax.f32 %v232_v21, 384.14944  ;;  %v233_v39 = vadd.f32 %v1018_v20, %v219_v25  ;;  %v308_v21 = vmul.f32 %v306_v48, %v876_v7 }
  0xa8   :  { %v272_v42 = vadd.f32 %v268_v30, %v258_v35  ;;  %v266_v38 = vpop.permute.xlu0 %265  ;;  %v316_v30 = vmul.f32 %v1104_v19, %v314_v52 }
  0xa9   :  { %v236_v44 = vmin.f32 %v234_v33, 133.30156  ;;  %v235_v45 = vmax.f32 %v233_v39, 384.14944  ;;  %v271_v50 = vadd.f32 %v266_v38, %v257_v23  ;;  %v445_v23 = vmul.f32 %v444_v4, %v869_v5 }
  0xaa   :  { %v280_v61 = vadd.f32 %v278_v28, %v272_v42  ;;  %v453_v5 = vmul.f32 %v993_v6, %v452_v27 }
  0xab   :  { %239 = vst.msk [vmem:[#allocation7 + $0x8] sm:$0xff] %vm139_vm0, %v236_v44  ;;  %v237_v20 = vmin.f32 %v235_v45, 133.30156  ;;  %v279_v60 = vadd.f32 %v277_v32, %v271_v50  ;;  %v447_v38 = vadd.f32 %v445_v23, %v440_v18  ;;  %v347_v44 = vmul.f32 %v345_v3, %v890_v12 }
  0xac   :  { %v288_v13 = vadd.f32 %v286_v56, %v280_v61  ;;  %v545_v18 = vmul.f32 %v543_v37, %v890_v12  ;;  %v355_v3 = vmul.f32 %v1033_v26, %v353_v17  ;;  %v573_v56 = vstv %s1219_s18 }
  0xad   :  { %240 = vst.msk [vmem:[#allocation7 + $0x38] sm:$0xff] %vm139_vm0, %v237_v20  ;;  %v287_v58 = vadd.f32 %v285_v46, %v279_v60  ;;  %v455_v52 = vadd.f32 %v453_v5, %v447_v38  ;;  %v349_v27 = vadd.f32 %v347_v44, %v341_v16  ;;  %v475_v20 = vmul.f32 %v863_v2, %v474_v51 }
  0xae   :  { %v496_v24 = vpop.permute.xlu2 %495  ;;  %v547_v37 = vadd.f32 %v545_v18, %v539_v40  ;;  %v553_v61 = vmul.f32 %v1033_v26, %v551_v41  ;;  %v574_v16 = vmul.f32 %v863_v2, %v573_v56  ;;  %v377_v2 = vmul.f32 %v883_v10, %v375_v9 }
  0xaf   :  { %v500_v31 = vadd.f32 %v496_v24, %v486_v63  ;;  %v326_v8 = vpop.permute.xlu1 %325  ;;  %v301_v35 = vadd.f32 %v1076_v49, %v287_v58  ;;  %v581_v24 = vstv %s1226_s0  ;;  %v483_v58 = vmul.f32 %v1041_v29, %v482_v22 }
  0xb0   :  { %v298_v25 = vpop.permute.xlu0 %297  ;;  %v582_v40 = vmul.f32 %v1041_v29, %v581_v24  ;;  %v505_v29 = vmul.f32 %v504_v43, %v858_v0  ;;  %v385_v9 = vmul.f32 %v1085_v55, %v383_v34  ;;  %v405_v43 = vstv %s1259_s25 }
  0xb1   :  { %v508_v11 = vadd.f32 %v506_v53, %v500_v31  ;;  %v309_v63 = vadd.f32 %v307_v57, %v301_v35  ;;  %v302_v28 = vadd.f32 %v298_v25, %v288_v13  ;;  %v357_v57 = vadd.f32 %v355_v3, %v349_v27 }
  0xb2   :  { %v400_v44 = vadd.f32 %v1189_v54, %v1146_v15  ;;  %v413_v18 = vstv %s725_s27 }
  0xb3   :  { %v1217_v32 = vadd.f32 %v514_v62, %v508_v11  ;;  %v317_v14 = vadd.f32 %v315_v1, %v309_v63  ;;  %v310_v33 = vadd.f32 %v308_v21, %v302_v28  ;;  %v555_v1 = vadd.f32 %v553_v61, %v547_v37 }
  0xb4   :  { %v583_v28 = vmul.f32 %v1085_v55, %v581_v24 }
  0xb5   :  { %v331_v49 = vadd.f32 %v326_v8, %v317_v14  ;;  %v318_v42 = vadd.f32 %v316_v30, %v310_v33  ;;  %v575_v8 = vmul.f32 %v883_v10, %v573_v56  ;;  %v513_v10 = vmul.f32 %v1073_v47, %v512_v36 }
  0xb6   :  { %v328_v39 = vpop.permute.xlu2 %327  ;;  %v603_v30 = vstv %s1257_s23  ;;  %v406_v36 = vmul.f32 %v405_v43, %v858_v0  ;;  %v414_v56 = vmul.f32 %v1073_v47, %v413_v18 }
  0xb7   :  { %v464_v4 = vpop.permute.xlu1 %463  ;;  %v333_v45 = vmax.f32 %v331_v49, 384.14944  ;;  %v332_v46 = vadd.f32 %v328_v39, %v318_v42  ;;  %v407_v39 = vmul.f32 %v405_v43, %v876_v7  ;;  %v611_v49 = vstv %s1265_s26 }
  0xb8   :  { %v367_v50 = vpop.permute.xlu0 %366  ;;  %v469_v12 = vadd.f32 %v464_v4, %v455_v52  ;;  %v605_v5 = vmul.f32 %v603_v30, %v876_v7  ;;  %v408_v3 = vadd.f32 %v406_v36, %v400_v44  ;;  %v604_v15 = vmul.f32 %v603_v30, %v858_v0 }
  0xb9   :  { %v335_v48 = vmin.f32 %v333_v45, 133.30156  ;;  %v334_v53 = vmax.f32 %v332_v46, 384.14944  ;;  %v371_v26 = vadd.f32 %v367_v50, %v357_v57  ;;  %v613_v46 = vmul.f32 %v1104_v19, %v611_v49 }
  0xba   :  { %v477_v31 = vadd.f32 %v475_v20, %v469_v12  ;;  %v416_v24 = vadd.f32 %v414_v56, %v408_v3 }
  0xbb   :  { %338 = vst.msk [vmem:[#allocation7 + $0x10] sm:$0xff] %vm139_vm0, %v335_v48  ;;  %v336_v6 = vmin.f32 %v334_v53, 133.30156  ;;  %v379_v35 = vadd.f32 %v377_v2, %v371_v26 }
  0xbd   :  { %339 = vst.msk [vmem:[#allocation7 + $0x40] sm:$0xff] %vm139_vm0, %v336_v6  ;;  %v387_v14 = vadd.f32 %v385_v9, %v379_v35  ;;  %v415_v6 = vmul.f32 %v1104_v19, %v413_v18 }
  0xbe   :  { %v524_v25 = vpop.permute.xlu2 %523 }
  0xbf   :  { %v565_v60 = vpop.permute.xlu1 %564 }
  0xc0   :  { %v563_v17 = vpop.permute.xlu0 %562  ;;  %v569_v22 = vadd.f32 %v565_v60, %v555_v1 }
  0xc1   :  { %v568_v51 = vadd.f32 %v563_v17, %v1178_v59  ;;  %v485_v59 = vadd.f32 %v483_v58, %v477_v31 }
  0xc2   :  { %v577_v23 = vadd.f32 %v575_v8, %v569_v22 }
  0xc3   :  { %v576_v41 = vadd.f32 %v574_v16, %v568_v51  ;;  %v612_v16 = vmul.f32 %v1073_v47, %v611_v49 }
  0xc4   :  { %v585_v34 = vadd.f32 %v583_v28, %v577_v23 }
  0xc5   :  { %v584_v62 = vadd.f32 %v582_v40, %v576_v41 }
  0xc6   :  { %v625_v27 = vpop.permute.xlu2 %624 }
  0xc7   :  { %v494_v11 = vpop.permute.xlu1 %493 }
  0xc8   :  { %v499_v13 = vadd.f32 %v494_v11, %v485_v59  ;;  %v397_v21 = vpop.permute.xlu0 %396 }
  0xc9   :  { %v401_v42 = vadd.f32 %v397_v21, %v387_v14 }
  0xca   :  { %v507_v63 = vadd.f32 %v505_v29, %v499_v13 }
  0xcb   :  { %v409_v48 = vadd.f32 %v407_v39, %v401_v42 }
  0xcc   :  { %v515_v33 = vadd.f32 %v513_v10, %v507_v63 }
  0xcd   :  { %v417_v12 = vadd.f32 %v415_v6, %v409_v48 }
  0xce   :  { %v529_v38 = vadd.f32 %v524_v25, %v515_v33 }
  0xcf   :  { %v595_v4 = vpop.permute.xlu1 %594 }
  0xd0   :  { %v531_v45 = vmax.f32 %v529_v38, 384.14944  ;;  %v599_v55 = vadd.f32 %v595_v4, %v585_v34  ;;  %v593_v50 = vpop.permute.xlu0 %592 }
  0xd1   :  { %v598_v54 = vadd.f32 %v593_v50, %v584_v62 }
  0xd2   :  { %v533_v53 = vmin.f32 %v531_v45, 133.30156  ;;  %v607_v52 = vadd.f32 %v605_v5, %v599_v55 }
  0xd3   :  { %v606_v19 = vadd.f32 %v604_v15, %v598_v54 }
  0xd4   :  { %536 = vst.msk [vmem:[#allocation7 + $0x20] sm:$0xff] %vm139_vm0, %v533_v53  ;;  %v615_v7 = vadd.f32 %v613_v46, %v607_v52 }
  0xd5   :  { %v614_v40 = vadd.f32 %v612_v16, %v606_v19 }
  0xd6   :  { %v629_v20 = vadd.f32 %v625_v27, %v615_v7 }
  0xd7   :  { %v427_v37 = vpop.permute.xlu1 %426 }
  0xd8   :  { %v631_v61 = vmax.f32 %v629_v20, 384.14944  ;;  %v431_v60 = vadd.f32 %v427_v37, %v417_v12  ;;  %v425_v57 = vpop.permute.xlu0 %424 }
  0xd9   :  { %v430_v31 = vadd.f32 %v425_v57, %v416_v24 }
  0xda   :  { %v633_v17 = vmin.f32 %v631_v61, 133.30156  ;;  %v433_v58 = vmax.f32 %v431_v60, 384.14944 }
  0xdb   :  { %v432_v51 = vmax.f32 %v430_v31, 384.14944 }
  0xdc   :  { %636 = vst.msk [vmem:[#allocation7 + $0x58] sm:$0xff] %vm139_vm0, %v633_v17  ;;  %v435_v1 = vmin.f32 %v433_v58, 133.30156 }
  0xdd   :  { %v434_v0 = vmin.f32 %v432_v51, 133.30156 }
  0xde   :  { %438 = vst.msk [vmem:[#allocation7 + $0x48] sm:$0xff] %vm139_vm0, %v435_v1 }
  0xdf   :  { %v623_v2 = vpop.permute.xlu1 %622  ;;  %437 = vst.msk [vmem:[#allocation7 + $0x18] sm:$0xff] %vm139_vm0, %v434_v0 }
  0xe0   :  { %v628_v26 = vadd.f32 %v623_v2, %v614_v40  ;;  %v526_v41 = vpop.permute.xlu0 %525 }
  0xe1   :  { %v530_v47 = vadd.f32 %v526_v41, %v1217_v32 }
  0xe2   :  { %v630_v8 = vmax.f32 %v628_v26, 384.14944 }
  0xe3   :  { %v532_v59 = vmax.f32 %v530_v47, 384.14944 }
  0xe4   :  { %v632_v22 = vmin.f32 %v630_v8, 133.30156 }
  0xe5   :  { %v534_v29 = vmin.f32 %v532_v59, 133.30156 }
  0xe6   :  { %635 = vst.msk [vmem:[#allocation7 + $0x28] sm:$0xff] %vm139_vm0, %v632_v22 }
  0xe7   :  { %537 = vst.msk [vmem:[#allocation7 + $0x50] sm:$0xff] %vm139_vm0, %v534_v29 }
  0xe8   :  { %649 = dma.vmem_to_hbm [thread:$0]  %s642_s17, 1536, %s644_s21, [#allocation3], %s827_s22, %s827_s22, %s828_s1  }
  0xe9   :  { %821 = dma.done.wait [#allocation3], 1536  }
  0xea   :  { %822 = vsyncadd [#allocation3], 4294965760 }
  0xeb   :  { %654 = vsyncpa [#allocation3], 1 }
  0xec   :  { %655 = vsyncpa [#allocation4], 1 }
  0xed   :  { %656 = vsyncpa [#allocation6], 1 }

</bundles_post_ra>
